<compile_context>
chip_gen: v7x
topology: tpu7x:2x2x1
jax: 0.10.0
libtpu: 0.0.40
codegen_flags: <defaults>
</compile_context>

<pallas_src>
import math
import functools

import jax
import jax.numpy as jnp
from jax.experimental import pallas as pl
from jax.experimental.pallas import tpu as pltpu


def _round_up(x: int, m: int) -> int:
    return ((x + m - 1) // m) * m


def _pe_kernel(inv_freq_ref, odd_ref, o_ref, *, tile_rows: int):
    """Writes one (tile_rows, d_model) tile of the sinusoidal table.

    inv_freq_ref / odd_ref are (1, d_model) rows resident in VMEM (constant
    index_map) -> zero exp() in the kernel.  The position index is a narrow
    (tile_rows, 1) column; the multiply broadcasts it across lanes.
    Even lanes get sin(angle), odd lanes get cos(angle) (exact, no pi/2 shift).
    """
    i = pl.program_id(0)
    pos_i = jax.lax.broadcasted_iota(jnp.int32, (tile_rows, 1), 0) + i * tile_rows
    pos = pos_i.astype(jnp.float32)                        # (tile_rows, 1)
    angle = pos * inv_freq_ref[...]                        # (tile_rows, d_model)
    out = jnp.where(odd_ref[...] != 0.0, jnp.cos(angle), jnp.sin(angle))
    o_ref[...] = out.astype(o_ref.dtype)


def positional_encoding(length: int, d_model: int = 512,
                        out_dtype=jnp.float32,
                        target_block_bytes: int = 4 << 20) -> jax.Array:
    """Pallas equivalent of the PositionalEncoding table for rows [0, length).

    Returns an array of shape (1, length, d_model) in `out_dtype`.
    """
    assert d_model % 2 == 0, "sin/cos pairing assumes an even d_model"
    assert length >= 1

    # ---- choose the row tile -------------------------------------------------
    # ~4 MiB output blocks (double-buffered ~8 MiB: inside default scoped VMEM
    # on v5e/v6e/v7x).  Row tile is a multiple of 8 (or the full extent for
    # tiny tables); lane dim is the full d_model -> no padding, no slice copy.
    bytes_per_row = d_model * 4
    rows_cap = max(8, (target_block_bytes // bytes_per_row) // 8 * 8)
    if length < 8:
        tile_rows = length                     # block row dim == full array dim
    else:
        tile_rows = min(rows_cap, _round_up(length, 8))

    grid_n = pl.cdiv(length, tile_rows)
    # v7x megacore balance: the ("parallel",) row grid is the only way the 2nd
    # TensorCore is used; prefer an even grid (>= 4 steps) while keeping each
    # tile >= ~512 KiB so grid-step overhead stays negligible.
    min_rows = max(8, ((512 << 10) // bytes_per_row) // 8 * 8)
    if grid_n < 4 and length >= 4 * min_rows:
        tile_rows = max(min_rows, _round_up(pl.cdiv(length, 4), 8))
    elif grid_n > 1 and grid_n % 2 == 1:
        tile_rows = max(8, _round_up(pl.cdiv(length, grid_n + 1), 8))
    grid_n = pl.cdiv(length, tile_rows)

    # ---- tiny per-column tables (built once, outside the kernel) -------------
    # div_term is built with the exact same f32 expression as the reference and
    # repeated per lane pair, so kernel angles match the reference bit-for-bit.
    half = jnp.exp(jnp.arange(0, d_model, 2, dtype=jnp.float32)
                   * (-math.log(10000.0) / d_model))
    inv_freq = jnp.repeat(half, 2)[None, :]                     # (1, d_model)
    odd = (jnp.arange(d_model, dtype=jnp.int32) % 2).astype(jnp.float32)[None, :]

    # TODO(synk): for d_model < 128 one could pack 128//d_model logical rows per
    # lane row to avoid masked stores; skipped (full-extent block is correct and
    # those tables are tiny).
    pe = pl.pallas_call(
        functools.partial(_pe_kernel, tile_rows=tile_rows),
        out_shape=jax.ShapeDtypeStruct((length, d_model), out_dtype),
        grid_spec=pltpu.PrefetchScalarGridSpec(
            num_scalar_prefetch=0,
            grid=(grid_n,),
            in_specs=[
                pl.BlockSpec((1, d_model), lambda i: (0, 0)),   # inv_freq
                pl.BlockSpec((1, d_model), lambda i: (0, 0)),   # odd-lane mask
            ],
            out_specs=pl.BlockSpec((tile_rows, d_model), lambda i: (i, 0)),
        ),
        compiler_params=pltpu.CompilerParams(
            dimension_semantics=("parallel",)),   # shards rows across TCs (v7x)
    )(inv_freq, odd)

    return pe[None]  # (1, length, d_model)


class PositionalEncoding:
    """Mirrors the PyTorch module: table built once in __init__, forward = slice.

    The Pallas kernel runs only here; the per-call cost is the pe[:, :length]
    device slice, which XLA fuses into the downstream add when jitted.
    """

    def __init__(self, d_model: int = 512, max_len: int = 10000,
                 dtype=jnp.float32) -> None:
        self.d_model = d_model
        self.max_len = max_len
        self.pe = positional_encoding(max_len, d_model=d_model, out_dtype=dtype)

    def forward(self, length: int) -> jax.Array:
        return self.pe[:, :length]

    __call__ = forward


def _reference(length: int, d_model: int) -> jnp.ndarray:
    """Pure-JAX reference mirroring the PyTorch __init__ construction."""
    position = jnp.arange(length, dtype=jnp.float32)[:, None]
    div_term = jnp.exp(jnp.arange(0, d_model, 2, dtype=jnp.float32)
                       * (-math.log(10000.0) / d_model))
    pe = jnp.zeros((length, d_model), jnp.float32)
    pe = pe.at[:, 0::2].set(jnp.sin(position * div_term))
    pe = pe.at[:, 1::2].set(jnp.cos(position * div_term))
    return pe[None]


if __name__ == "__main__":
    # forward() takes only an integer `length`; no tensor inputs are needed.
    # PRNGKey(0) created only for determinism-convention consistency.
    _ = jax.random.PRNGKey(0)

    # Case 1: lane-dense d_model, ragged length (exercises grid clipping of the
    # last row block; no padding, no post-kernel slice).
    d_model, length = 128, 100
    out = jax.block_until_ready(positional_encoding(length, d_model=d_model))
    ref = _reference(length, d_model)
    assert out.shape == (1, length, d_model)
    assert jnp.allclose(out, ref, atol=1e-4, rtol=1e-5)

    # Case 2: tiny d_model (full-extent lane block, masked edge stores).
    d_model2, length2 = 32, 16
    out2 = jax.block_until_ready(positional_encoding(length2, d_model=d_model2))
    ref2 = _reference(length2, d_model2)
    assert out2.shape == (1, length2, d_model2)
    assert jnp.allclose(out2, ref2, atol=1e-4, rtol=1e-5)

    # Case 3: module-style usage — table cached in __init__, forward is a slice.
    enc = PositionalEncoding(d_model=128, max_len=512)
    out3 = jax.block_until_ready(enc.forward(48))
    ref3 = _reference(48, 128)
    assert out3.shape == (1, 48, 128)
    assert jnp.allclose(out3, ref3, atol=1e-4, rtol=1e-5)

    print("KERNEL_OK")
</pallas_src>

<mosaic_0001>
module attributes {stable_mosaic.version = 11 : i64} {
  func.func @_pe_kernel(%arg0: i32, %arg1: memref<1x128xf32, #tpu.memory_space<vmem>>, %arg2: memref<1x128xf32, #tpu.memory_space<vmem>>, %arg3: memref<104x128xf32, #tpu.memory_space<vmem>>) attributes {dimension_semantics = [#tpu.dimension_semantics<parallel>], iteration_bounds = array<i64: 1>, scalar_prefetch = 0 : i64, scratch_operands = 0 : i64, tpu.core_type = #tpu.core_type<tc>, window_params = [{pipeline_mode = #tpu.pipeline_mode<synchronous>, transform_indices = @transform_0, window_bounds = array<i64: 1, 128>}, {pipeline_mode = #tpu.pipeline_mode<synchronous>, transform_indices = @transform_1, window_bounds = array<i64: 1, 128>}, {transform_indices = @transform_2, window_bounds = array<i64: 104, 128>}]} {
    %0 = tpu.iota {dimensions = array<i32: 0>} : vector<104x1xi32>
    %c104_i32 = arith.constant 104 : i32
    %1 = arith.muli %arg0, %c104_i32 : i32
    %2 = vector.broadcast %1 : i32 to vector<104x1xi32>
    %3 = arith.addi %0, %2 : vector<104x1xi32>
    %4 = arith.sitofp %3 : vector<104x1xi32> to vector<104x1xf32>
    %c0 = arith.constant 0 : index
    %c0_0 = arith.constant 0 : index
    %5 = vector.load %arg1[%c0, %c0_0] : memref<1x128xf32, #tpu.memory_space<vmem>>, vector<1x128xf32>
    %6 = vector.broadcast %4 : vector<104x1xf32> to vector<104x128xf32>
    %7 = vector.broadcast %5 : vector<1x128xf32> to vector<104x128xf32>
    %8 = arith.mulf %6, %7 : vector<104x128xf32>
    %c0_1 = arith.constant 0 : index
    %c0_2 = arith.constant 0 : index
    %9 = vector.load %arg2[%c0_1, %c0_2] : memref<1x128xf32, #tpu.memory_space<vmem>>, vector<1x128xf32>
    %cst = arith.constant 0.000000e+00 : f32
    %10 = vector.broadcast %cst : f32 to vector<1x128xf32>
    %11 = arith.cmpf one, %9, %10 : vector<1x128xf32>
    %12 = math.cos %8 : vector<104x128xf32>
    %13 = math.sin %8 : vector<104x128xf32>
    %14 = vector.shape_cast %11 : vector<1x128xi1> to vector<1x128xi1>
    %15 = vector.broadcast %14 : vector<1x128xi1> to vector<104x128xi1>
    %16 = arith.select %15, %12, %13 : vector<104x128xi1>, vector<104x128xf32>
    %c0_3 = arith.constant 0 : index
    %c0_4 = arith.constant 0 : index
    %17 = vector.load %arg3[%c0_3, %c0_4] : memref<104x128xf32, #tpu.memory_space<vmem>>, vector<104x128xf32>
    tpu.vector_store %arg3[%c0_3, %c0_4], %16 {strides = array<i32>} : memref<104x128xf32, #tpu.memory_space<vmem>>, vector<104x128xf32>,
    return
  }
  func.func @transform_0(%arg0: i32) -> (i32, i32) {
    %c0_i32 = arith.constant 0 : i32
    %c0_i32_0 = arith.constant 0 : i32
    %c0_i32_1 = arith.constant 0 : i32
    return %c0_i32, %c0_i32_0 : i32, i32
  }
  func.func @transform_1(%arg0: i32) -> (i32, i32) {
    %c0_i32 = arith.constant 0 : i32
    %c0_i32_0 = arith.constant 0 : i32
    %c0_i32_1 = arith.constant 0 : i32
    return %c0_i32, %c0_i32_0 : i32, i32
  }
  func.func @transform_2(%arg0: i32) -> (i32, i32) {
    %c0_i32 = arith.constant 0 : i32
    %c0_i32_0 = arith.constant 0 : i32
    return %arg0, %c0_i32 : i32, i32
  }
}

</mosaic_0001>

<bundles_post_ra>
// kernel: tpu_custom_call.1
= control target key start
LH: loop header
LB: loop body
LE: loop exit
PB: predicated region body
PF: predicated region fallthrough
CT: control target
= control target key end

     0   :  { %7 = vsyncpa [#allocation3], 0  ;;  %s4780_s0 = inlined_call_operand.hbm [shape: f32[1,128], index: 0, kind: input, shape index: {}]   ;;  %s4781_s1 = inlined_call_operand.vmem [shape: f32[1,128], index: 1, kind: input, shape index: {}]   ;;  %s4782_s2 = inlined_call_operand.hbm [shape: f32[100,128], index: 2, kind: output, shape index: {}]  }
   0x1   :  { %8 = vsyncpa [#allocation4], 0  ;;  %s3096_s9 = smov [#allocation2]   ;;  %s3048_s13 = scalar_lea.hbm %s4780_s0, 16 }
   0x2   :  { %s15_s10 = sshll.u32 %s3096_s9, 4  ;;  %p3049_p0 = scmp.ne.s32.totalorder %s4780_s0, %s3048_s13  ;;  %s16_s10 = int_to_ptr.vmem [resolvable:$true] %s15_s10 }
   0x3   :  { %p3052_p1 = scmp.lt.u32.totalorder %s3048_s13, %s4780_s0 }
   0x5   :  { %p3054_p2 = pnand %p3052_p1, %p3049_p0 }
   0x7   :  { %3057 = shalt.err (!%p3054_p2)
}
   0x8   :  { %s3058_s18 = scalar_lea.vmem %s16_s10, 16  ;;  %s3062_s19 = scalar_lea.vmem %s16_s10, 32 }
   0x9   :  { %p3059_p3 = scmp.ne.s32.totalorder %s16_s10, %s3058_s18  ;;  %p3063_p4 = scmp.lt.s32.totalorder %s16_s10, %s16_s10 }
   0xa   :  { %p3064_p5 = scmp.lt.s32.totalorder %s3062_s19, %s3058_s18 }
   0xc   :  { %p3065_p6 = por %p3064_p5, %p3063_p4 }
   0xe   :  { %p3066_p7 = pnand %p3065_p6, %p3059_p3 }
  0x10   :  { %3069 = shalt.err (!%p3066_p7)
}
  0x11   :  { %18 = dma.hbm_to_vmem [thread:$0]  %s4780_s0, 16, %s16_s10, [#allocation3]  }
  0x12   :  { %3092 = dma.done.wait [#allocation3], 16  }
  0x13   :  { %3093 = vsyncadd [#allocation3], 4294967280  ;;  %v24_v0 = vlaneseq  ;;  %v3139_v6 = vld [vmem:[#allocation2] ss:$0 sm:$0xff]  ;;  %v4796_v39 = vmov 683565275  }
  0x14   :  { %v4794_v41 = vmov 2475754826   ;;  %v4792_v43 = vmov 2131351028   ;;  %v4785_v45 = vmov 2102212464  }
  0x15   :  { %v3134_v1 = vshrl.u32 %v24_v0, 7  ;;  %v4789_v47 = vmov 920167782   ;;  %v4787_v55 = vmov 1326507024  }
  0x17   :  { %4849 = vst [vmem:[#allocation8_spill] sm:$0xff] %v3134_v1  ;;  %v26_v2 = vadd.s32 8, %v3134_v1  ;;  %v27_v3 = vadd.s32 16, %v3134_v1  ;;  %v53_v4 = vcvt.s32.f32 %v3134_v1  ;;  %v3160_v22 = vadd.s32 24, %v3134_v1 }
  0x19   :  { %v54_v5 = vcvt.s32.f32 %v26_v2  ;;  %v55_v7 = vcvt.s32.f32 %v27_v3  ;;  %v3142_v8 = vmul.f32 %v3139_v6, %v53_v4  ;;  %v56_v30 = vcvt.s32.f32 %v3160_v22 }
  0x1b   :  { %4850 = vst [vmem:[#allocation9_spill] sm:$0xff] %v3142_v8  ;;  %v3145_v9 = vmul.f32 %v3139_v6, %v54_v5  ;;  %v88_v10 = vand.u32 2147483647, %v3142_v8  ;;  %v3149_v11 = vmul.f32 %v3139_v6, %v55_v7  ;;  %v91_v12 = vand.u32 2139095040, %v3142_v8 }
  0x1d   :  { %4851 = vst [vmem:[#allocation10_spill] sm:$0xff] %v3145_v9  ;;  %4852 = vst [vmem:[#allocation11_spill] sm:$0xff] %v3149_v11  ;;  %v191_v13 = vand.u32 2147483647, %v3145_v9  ;;  %v194_v14 = vand.u32 2139095040, %v3145_v9  ;;  %v92_v15 = vshrl.u32 %v91_v12, 23 }
  0x1e   :  { %v95_v16 = vand.u32 8388607, %v88_v10  ;;  %v297_v20 = vand.u32 2139095040, %v3149_v11 }
  0x1f   :  { %v195_v17 = vshrl.u32 %v194_v14, 23  ;;  %v198_v18 = vand.u32 8388607, %v191_v13  ;;  %v2829_v19 = vadd.s32 4294967169, %v92_v15 }
  0x20   :  { %v298_v24 = vshrl.u32 %v297_v20, 23  ;;  %v96_v25 = vor.u32 8388608, %v95_v16 }
  0x21   :  { %v2833_v21 = vadd.s32 4294967169, %v195_v17  ;;  %v98_v23 = vadd.s32 1, %v2829_v19  ;;  %v199_v26 = vor.u32 8388608, %v198_v18 }
  0x22   :  { %v2837_v28 = vadd.s32 4294967169, %v298_v24  ;;  %v3163_v34 = vshll.u32 %v96_v25, 8 }
  0x23   :  { %v201_v27 = vadd.s32 1, %v2833_v21  ;;  %vm99_vm0 = vcmp.gt.s32.totalorder %v98_v23, 0  ;;  %v3165_v36 = vshll.u32 %v199_v26, 8 }
  0x24   :  { %v100_v29 = vsel %vm99_vm0, %v98_v23, 0  ;;  %v3167_v37 = vadd.s32 1, %v2837_v28 }
  0x25   :  { %vm202_vm1 = vcmp.gt.s32.totalorder %v201_v27, 0  ;;  %v101_v31 = vshrl.u32 %v100_v29, 5  ;;  %v102_v32 = vand.u32 31, %v100_v29 }
  0x26   :  { %v203_v33 = vsel %vm202_vm1, %v201_v27, 0  ;;  %vm305_vm11 = vcmp.gt.s32.totalorder %v3167_v37, 0 }
  0x27   :  { %v205_v35 = vand.u32 31, %v203_v33  ;;  %v103_v38 = vsub.s32 32, %v102_v32  ;;  %v105_v40 = vshll.u32 %v4796_v39, %v102_v32  ;;  %v108_v42 = vshll.u32 %v4794_v41, %v102_v32 }
  0x28   :  { %v111_v44 = vshll.u32 %v4792_v43, %v102_v32  ;;  %v114_v46 = vshll.u32 %v4785_v45, %v102_v32  ;;  %v117_v48 = vshll.u32 %v4789_v47, %v102_v32  ;;  %vm120_vm2 = vcmp.lt.s32.totalorder %v101_v31, 1 }
  0x29   :  { %v3174_v49 = vshrl.u32 %v203_v33, 5  ;;  %v104_v50 = vshrl.u32 %v4796_v39, %v103_v38  ;;  %v106_v51 = vshrl.u32 %v4794_v41, %v103_v38  ;;  %v109_v52 = vshrl.u32 %v4792_v43, %v103_v38 }
  0x2a   :  { %v112_v53 = vshrl.u32 %v4785_v45, %v103_v38  ;;  %v115_v54 = vshrl.u32 %v4789_v47, %v103_v38  ;;  %v118_v56 = vshrl.u32 %v4787_v55, %v103_v38  ;;  %vm121_vm3 = vcmp.lt.s32.totalorder %v101_v31, 2 }
  0x2b   :  { %vm123_vm4 = vcmp.lt.s32.totalorder %v101_v31, 4  ;;  %v107_v57 = vor.u32 %v106_v51, %v105_v40  ;;  %v110_v58 = vor.u32 %v109_v52, %v108_v42  ;;  %v206_v60 = vsub.s32 32, %v205_v35 }
  0x2c   :  { %v113_v59 = vor.u32 %v112_v53, %v111_v44  ;;  %v116_v61 = vor.u32 %v115_v54, %v114_v46  ;;  %v119_v62 = vor.u32 %v118_v56, %v117_v48  ;;  %vm122_vm5 = vcmp.lt.s32.totalorder %v101_v31, 3 }
  0x2d   :  { %v208_v63 = vshll.u32 %v4796_v39, %v205_v35  ;;  %v124_v0 = vsel %vm120_vm2, %v104_v50, %v107_v57  ;;  %v128_v3 = vsel %vm120_vm2, %v107_v57, %v110_v58  ;;  %v211_v14 = vshll.u32 %v4794_v41, %v205_v35 }
  0x2e   :  { %v125_v2 = vsel %vm123_vm4, %v113_v59, 2102212464  ;;  %v132_v4 = vsel %vm120_vm2, %v110_v58, %v113_v59  ;;  %v129_v7 = vsel %vm123_vm4, %v116_v61, 920167782  ;;  %v133_v12 = vsel %vm123_vm4, %v119_v62, 1326507024 }
  0x2f   :  { %v126_v5 = vsel %vm122_vm5, %v110_v58, %v125_v2  ;;  %v130_v15 = vsel %vm122_vm5, %v113_v59, %v129_v7  ;;  %v134_v16 = vsel %vm122_vm5, %v116_v61, %v133_v12  ;;  %v207_v17 = vshrl.u32 %v4796_v39, %v206_v60 }
  0x30   :  { %v209_v18 = vshrl.u32 %v4794_v41, %v206_v60  ;;  %v127_v19 = vsel %vm121_vm3, %v124_v0, %v126_v5  ;;  %v131_v20 = vsel %vm121_vm3, %v128_v3, %v130_v15  ;;  %v135_v21 = vsel %vm121_vm3, %v132_v4, %v134_v16 }
  0x31   :  { %v212_v23 = vshrl.u32 %v4792_v43, %v206_v60  ;;  %v3194_v24 = vmul.u32.u64.low %v3163_v34, %v135_v21  ;;  %v3195_v25 = vmul.u32.u64.high %v3163_v34, %v135_v21, %v3194_v24  ;;  %v214_v32 = vshll.u32 %v4792_v43, %v205_v35 }
  0x32   :  { %v3198_v26 = vmul.u32.u64.low %v3163_v34, %v131_v20  ;;  %v3199_v27 = vmul.u32.u64.high %v3163_v34, %v131_v20, %v3198_v26  ;;  %v210_v28 = vor.u32 %v209_v18, %v208_v63  ;;  %v215_v33 = vshrl.u32 %v4785_v45, %v206_v60 }
  0x33   :  { %v213_v29 = vor.u32 %v212_v23, %v211_v14  ;;  %v217_v31 = vshll.u32 %v4785_v45, %v205_v35  ;;  %v218_v38 = vshrl.u32 %v4789_v47, %v206_v60  ;;  %v220_v40 = vshll.u32 %v4789_v47, %v205_v35 }
  0x34   :  { %v221_v42 = vshrl.u32 %v4787_v55, %v206_v60  ;;  %v143_v44 = vmul.u32 %v3163_v34, %v127_v19  ;;  %v216_v46 = vor.u32 %v215_v33, %v214_v32  ;;  %vm223_vm6 = vcmp.lt.s32.totalorder %v3174_v49, 1 }
  0x35   :  { %vm224_vm7 = vcmp.lt.s32.totalorder %v3174_v49, 2  ;;  %vm145_vm8 = vc.u32 %v3195_v25, %v3198_v26  ;;  %v146_v48 = vadd.s32 1, %v3199_v27  ;;  %v219_v50 = vor.u32 %v218_v38, %v217_v31 }
  0x36   :  { %vm225_vm9 = vcmp.lt.s32.totalorder %v3174_v49, 3  ;;  %v222_v51 = vor.u32 %v221_v42, %v220_v40  ;;  %vm226_vm10 = vcmp.lt.s32.totalorder %v3174_v49, 4  ;;  %v227_v35 = vsel %vm223_vm6, %v207_v17, %v210_v28 }
  0x37   :  { %v231_v52 = vsel %vm223_vm6, %v210_v28, %v213_v29  ;;  %v147_v34 = vsel %vm145_vm8, %v146_v48, %v3199_v27  ;;  %v228_v53 = vsel %vm226_vm10, %v216_v46, 2102212464  ;;  %v232_v54 = vsel %vm226_vm10, %v219_v50, 920167782 }
  0x38   :  { %v235_v56 = vsel %vm223_vm6, %v213_v29, %v216_v46  ;;  %v148_v57 = vadd.s32 %v147_v34, %v143_v44  ;;  %v229_v58 = vsel %vm225_vm9, %v213_v29, %v228_v53  ;;  %v233_v59 = vsel %vm225_vm9, %v216_v46, %v232_v54 }
  0x39   :  { %v236_v60 = vsel %vm226_vm10, %v222_v51, 1326507024  ;;  %v230_v61 = vsel %vm224_vm7, %v227_v35, %v229_v58  ;;  %v234_v62 = vsel %vm224_vm7, %v231_v52, %v233_v59  ;;  %v306_v12 = vsel %vm305_vm11, %v3167_v37, 0 }
  0x3a   :  { %v237_v63 = vsel %vm225_vm9, %v219_v50, %v236_v60  ;;  %v149_v0 = vadd.s32 536870912, %v148_v57  ;;  %v3225_v3 = vmul.u32.u64.low %v3165_v36, %v234_v62  ;;  %v3226_v4 = vmul.u32.u64.high %v3165_v36, %v234_v62, %v3225_v3 }
  0x3b   :  { %v238_v2 = vsel %vm224_vm7, %v235_v56, %v237_v63  ;;  %v308_v15 = vand.u32 31, %v306_v12  ;;  %v3239_v16 = vmul.f32 %v3139_v6, %v56_v30  ;;  %v246_v49 = vmul.u32 %v3165_v36, %v230_v61 }
  0x3c   :  { %v3230_v5 = vmul.u32.u64.low %v3165_v36, %v238_v2  ;;  %v3231_v7 = vmul.u32.u64.high %v3165_v36, %v238_v2, %v3230_v5  ;;  %v3234_v14 = vshrl.u32 %v149_v0, 30  ;;  %v249_v18 = vadd.s32 1, %v3226_v4 }
  0x3d   :  { %4853 = vst [vmem:[#allocation12_spill] sm:$0xff] %v3239_v16  ;;  %v294_v19 = vand.u32 2147483647, %v3149_v11  ;;  %v309_v20 = vsub.s32 32, %v308_v15  ;;  %v400_v30 = vand.u32 2139095040, %v3239_v16  ;;  %v311_v24 = vshll.u32 %v4796_v39, %v308_v15 }
  0x3e   :  { %v151_v17 = vshll.u32 %v3234_v14, 30  ;;  %vm248_vm12 = vc.u32 %v3231_v7, %v3225_v3  ;;  %v314_v29 = vshll.u32 %v4794_v41, %v308_v15  ;;  %v320_v33 = vshll.u32 %v4785_v45, %v308_v15 }
  0x3f   :  { %v250_v21 = vsel %vm248_vm12, %v249_v18, %v3226_v4  ;;  %v301_v36 = vand.u32 8388607, %v294_v19  ;;  %v312_v27 = vshrl.u32 %v4794_v41, %v309_v20  ;;  %v315_v32 = vshrl.u32 %v4792_v43, %v309_v20 }
  0x40   :  { %v3247_v37 = vsub.s32 %v148_v57, %v151_v17  ;;  %v251_v22 = vadd.s32 %v250_v21, %v246_v49  ;;  %v307_v38 = vshrl.u32 %v306_v12, 5  ;;  %v317_v40 = vshll.u32 %v4792_v43, %v308_v15 }
  0x41   :  { %v318_v42 = vshrl.u32 %v4785_v45, %v309_v20  ;;  %v321_v46 = vshrl.u32 %v4789_v47, %v309_v20  ;;  %v401_v48 = vshrl.u32 %v400_v30, 23  ;;  %v302_v51 = vor.u32 8388608, %v301_v36 }
  0x42   :  { %v154_v23 = vsub.s32 0, %v3247_v37  ;;  %v252_v28 = vadd.s32 536870912, %v251_v22  ;;  %v313_v35 = vor.u32 %v312_v27, %v311_v24  ;;  %v316_v52 = vor.u32 %v315_v32, %v314_v29 }
  0x43   :  { %v322_v34 = vor.u32 %v321_v46, %v320_v33  ;;  %v323_v53 = vshll.u32 %v4789_v47, %v308_v15  ;;  %v324_v54 = vshrl.u32 %v4787_v55, %v309_v20  ;;  %v319_v57 = vor.u32 %v318_v42, %v317_v40 }
  0x44   :  { %v2830_v31 = vmin.u32 %v154_v23, %v3247_v37  ;;  %v3262_v44 = vshrl.u32 %v252_v28, 30  ;;  %vm326_vm13 = vcmp.lt.s32.totalorder %v307_v38, 1  ;;  %vm329_vm14 = vcmp.lt.s32.totalorder %v307_v38, 4 }
  0x45   :  { %vm328_vm15 = vcmp.lt.s32.totalorder %v307_v38, 3  ;;  %v2841_v59 = vadd.s32 4294967169, %v401_v48  ;;  %v310_v60 = vshrl.u32 %v4796_v39, %v309_v20  ;;  %v335_v61 = vsel %vm329_vm14, %v322_v34, 920167782 }
  0x46   :  { %v156_v50 = vclz %v2830_v31  ;;  %v254_v58 = vshll.u32 %v3262_v44, 30  ;;  %v342_v62 = vshll.u32 %v302_v51, 8  ;;  %v325_v63 = vor.u32 %v324_v54, %v323_v53 }
  0x47   :  { %vm327_vm0 = vcmp.lt.s32.totalorder %v307_v38, 2  ;;  %v331_v0 = vsel %vm329_vm14, %v319_v57, 2102212464  ;;  %v334_v2 = vsel %vm326_vm13, %v313_v35, %v316_v52  ;;  %v336_v4 = vsel %vm328_vm15, %v319_v57, %v335_v61 }
  0x48   :  { %v2831_v56 = vadd.s32 4294967294, %v156_v50  ;;  %v3273_v5 = vsub.s32 %v251_v22, %v254_v58  ;;  %v407_v12 = vadd.s32 1, %v2841_v59  ;;  %v330_v15 = vsel %vm326_vm13, %v310_v60, %v313_v35 }
  0x49   :  { %v332_v49 = vsel %vm328_vm15, %v316_v52, %v331_v0  ;;  %v337_v17 = vsel %vm327_vm0, %v334_v2, %v336_v4  ;;  %v338_v18 = vsel %vm326_vm13, %v316_v52, %v319_v57  ;;  %v339_v21 = vsel %vm329_vm14, %v325_v63, 1326507024 }
  0x4a   :  { %vm2832_vm1 = vcmp.lt.s32.totalorder %v2831_v56, 0  ;;  %v3280_v30 = vmul.u32.u64.low %v342_v62, %v337_v17  ;;  %v3281_v23 = vmul.u32.u64.high %v342_v62, %v337_v17, %v3280_v30  ;;  %v29_v36 = vadd.s32 32, %v3134_v1 }
  0x4b   :  { %v159_v20 = vsel %vm2832_vm1, 0, %v2831_v56  ;;  %v340_v22 = vsel %vm328_vm15, %v322_v34, %v339_v21  ;;  %v257_v24 = vsub.s32 0, %v3273_v5  ;;  %v333_v27 = vsel %vm327_vm0, %v330_v15, %v332_v49 }
  0x4c   :  { %v341_v28 = vsel %vm327_vm0, %v338_v18, %v340_v22  ;;  %vm408_vm2 = vcmp.gt.s32.totalorder %v407_v12, 0  ;;  %v164_v29 = vsub.s32 4294967266, %v159_v20  ;;  %v352_v31 = vadd.s32 1, %v3281_v23 }
  0x4d   :  { %v3289_v32 = vmul.u32.u64.low %v342_v62, %v341_v28  ;;  %v3290_v33 = vmul.u32.u64.high %v342_v62, %v341_v28, %v3289_v32  ;;  %v409_v40 = vsel %vm408_vm2, %v407_v12, 0  ;;  %v3294_v42 = vadd.s32 40, %v3134_v1 }
  0x4e   :  { %v349_v46 = vmul.u32 %v342_v62, %v333_v27  ;;  %v411_v48 = vand.u32 31, %v409_v40  ;;  %v3297_v50 = vadd.s32 48, %v3134_v1  ;;  %v57_v51 = vcvt.s32.f32 %v29_v36 }
  0x4f   :  { %v2834_v38 = vmin.u32 %v257_v24, %v3273_v5  ;;  %v4784_v35 = vand.u32 2147483647, %v3239_v16  ;;  %v144_v52 = vadd.s32 %v3198_v26, %v3195_v25  ;;  %v160_v34 = vsub.s32 32, %v159_v20 }
  0x50   :  { %v165_v53 = vadd.s32 127, %v164_v29  ;;  %vm351_vm3 = vc.u32 %v3290_v33, %v3280_v30  ;;  %v3306_v54 = vadd.s32 56, %v3134_v1  ;;  %v3309_v56 = vadd.s32 64, %v3134_v1 }
  0x51   :  { %v353_v57 = vsel %vm351_vm3, %v352_v31, %v3281_v23  ;;  %v412_v58 = vsub.s32 32, %v411_v48  ;;  %v3313_v59 = vadd.s32 72, %v3134_v1  ;;  %v3316_v60 = vadd.s32 80, %v3134_v1 }
  0x52   :  { %v3319_v25 = vadd.s32 88, %v3134_v1  ;;  %v354_v26 = vadd.s32 %v353_v57, %v349_v46  ;;  %v3322_v61 = vmul.f32 %v3139_v6, %v57_v51  ;;  %v161_v62 = vshll.u32 %v3247_v37, %v159_v20 }
  0x53   :  { %v259_v63 = vclz %v2834_v38  ;;  %v404_v0 = vand.u32 8388607, %v4784_v35  ;;  %v162_v2 = vshrl.u32 %v144_v52, %v160_v34  ;;  %v166_v4 = vshll.u32 %v165_v53, 23 }
  0x54   :  { %4854 = vst [vmem:[#allocation13_spill] sm:$0xff] %v3322_v61  ;;  %v355_v12 = vadd.s32 536870912, %v354_v26  ;;  %v410_v15 = vshrl.u32 %v409_v40, 5  ;;  %v414_v49 = vshll.u32 %v4796_v39, %v411_v48  ;;  %v415_v17 = vshrl.u32 %v4794_v41, %v412_v58 }
  0x55   :  { %v417_v18 = vshll.u32 %v4794_v41, %v411_v48  ;;  %v418_v21 = vshrl.u32 %v4792_v43, %v412_v58  ;;  %v420_v37 = vshll.u32 %v4792_v43, %v411_v48  ;;  %v421_v20 = vshrl.u32 %v4785_v45, %v412_v58 }
  0x56   :  { %v3331_v23 = vshrl.u32 %v355_v12, 30  ;;  %v423_v36 = vshll.u32 %v4785_v45, %v411_v48  ;;  %v3337_v22 = vadd.s32 96, %v3134_v1  ;;  %v2835_v24 = vadd.s32 4294967294, %v259_v63 }
  0x57   :  { %v405_v27 = vor.u32 8388608, %v404_v0  ;;  %v424_v28 = vshrl.u32 %v4789_v47, %v412_v58  ;;  %v163_v29 = vor.u32 %v162_v2, %v161_v62  ;;  %v426_v31 = vshll.u32 %v4789_v47, %v411_v48 }
  0x58   :  { %v357_v32 = vshll.u32 %v3331_v23, 30  ;;  %v427_v40 = vshrl.u32 %v4787_v55, %v412_v58  ;;  %v167_v46 = vor.u32 4788187, %v166_v4  ;;  %v416_v51 = vor.u32 %v415_v17, %v414_v49 }
  0x59   :  { %v419_v38 = vor.u32 %v418_v21, %v417_v18  ;;  %v425_v52 = vor.u32 %v424_v28, %v423_v36  ;;  %v422_v53 = vor.u32 %v421_v20, %v420_v37  ;;  %vm429_vm4 = vcmp.lt.s32.totalorder %v410_v15, 1 }
  0x5a   :  { %v3343_v34 = vsub.s32 %v354_v26, %v357_v32  ;;  %v503_v57 = vand.u32 2139095040, %v3322_v61  ;;  %vm2836_vm5 = vcmp.lt.s32.totalorder %v2835_v24, 0  ;;  %v413_v63 = vshrl.u32 %v4796_v39, %v412_v58 }
  0x5b   :  { %vm432_vm6 = vcmp.lt.s32.totalorder %v410_v15, 4  ;;  %v445_v62 = vshll.u32 %v405_v27, 8  ;;  %v428_v48 = vor.u32 %v427_v40, %v426_v31  ;;  %vm431_vm7 = vcmp.lt.s32.totalorder %v410_v15, 3 }
  0x5c   :  { %v360_v0 = vsub.s32 0, %v3343_v34  ;;  %v434_v2 = vsel %vm432_vm6, %v422_v53, 2102212464  ;;  %v170_v4 = vcvt.s32.f32 %v163_v29  ;;  %vm430_vm8 = vcmp.lt.s32.totalorder %v410_v15, 2 }
  0x5d   :  { %v437_v26 = vsel %vm429_vm4, %v416_v51, %v419_v38  ;;  %v438_v12 = vsel %vm432_vm6, %v425_v52, 920167782  ;;  %v168_v49 = vand.u32 2147483647, %v167_v46  ;;  %v262_v17 = vsel %vm2836_vm5, 0, %v2835_v24 }
  0x5e   :  { %v2838_v18 = vmin.u32 %v360_v0, %v3343_v34  ;;  %v504_v21 = vshrl.u32 %v503_v57, 23  ;;  %v433_v58 = vsel %vm429_vm4, %v413_v63, %v416_v51  ;;  %v435_v37 = vsel %vm431_vm7, %v419_v38, %v434_v2 }
  0x5f   :  { %v439_v20 = vsel %vm431_vm7, %v422_v53, %v438_v12  ;;  %v441_v36 = vsel %vm429_vm4, %v419_v38, %v422_v53  ;;  %v58_v27 = vcvt.s32.f32 %v3294_v42  ;;  %v442_v32 = vsel %vm432_vm6, %v428_v48, 1326507024 }
  0x60   :  { %v362_v28 = vclz %v2838_v18  ;;  %v440_v29 = vsel %vm430_vm8, %v437_v26, %v439_v20  ;;  %v59_v24 = vcvt.s32.f32 %v3297_v50  ;;  %v443_v31 = vsel %vm431_vm7, %v425_v52, %v442_v32 }
  0x61   :  { %v3361_v40 = vmul.u32.u64.low %v445_v62, %v440_v29  ;;  %v3362_v46 = vmul.u32.u64.high %v445_v62, %v440_v29, %v3361_v40  ;;  %v171_v51 = vmul.f32 %v170_v4, %v168_v49  ;;  %v267_v57 = vsub.s32 4294967266, %v262_v17 }
  0x62   :  { %v436_v63 = vsel %vm430_vm8, %v433_v58, %v435_v37  ;;  %v444_v38 = vsel %vm430_vm8, %v441_v36, %v443_v31  ;;  %v60_v42 = vcvt.s32.f32 %v3306_v54  ;;  %v2845_v48 = vadd.s32 4294967169, %v504_v21 }
  0x63   :  { %v3368_v53 = vmul.u32.u64.low %v445_v62, %v444_v38  ;;  %v3369_v0 = vmul.u32.u64.high %v445_v62, %v444_v38, %v3368_v53  ;;  %v61_v50 = vcvt.s32.f32 %v3309_v56  ;;  %v62_v52 = vcvt.s32.f32 %v3313_v59 }
  0x64   :  { %v247_v2 = vadd.s32 %v3225_v3, %v3231_v7  ;;  %v2839_v26 = vadd.s32 4294967294, %v362_v28  ;;  %v263_v4 = vsub.s32 32, %v262_v17  ;;  %v452_v12 = vmul.u32 %v445_v62, %v436_v63 }
  0x65   :  { %v455_v49 = vadd.s32 1, %v3362_v46  ;;  %v510_v15 = vadd.s32 1, %v2845_v48  ;;  %v63_v18 = vcvt.s32.f32 %v3316_v60  ;;  %v64_v54 = vcvt.s32.f32 %v3319_v25 }
  0x66   :  { %v172_v58 = vxor.u32 2147483648, %v171_v51  ;;  %v268_v37 = vadd.s32 127, %v267_v57  ;;  %v65_v21 = vcvt.s32.f32 %v3337_v22  ;;  %vm90_vm9 = vcmp.lt.s32.totalorder %v3142_v8, 0 }
  0x67   :  { %vm454_vm10 = vc.u32 %v3369_v0, %v3361_v40  ;;  %vm511_vm11 = vcmp.gt.s32.totalorder %v510_v15, 0  ;;  %v3383_v3 = vmul.f32 %v3139_v6, %v58_v27  ;;  %vm2840_vm12 = vcmp.lt.s32.totalorder %v2839_v26, 0 }
  0x68   :  { %v456_v7 = vsel %vm454_vm10, %v455_v49, %v3362_v46  ;;  %v512_v56 = vsel %vm511_vm11, %v510_v15, 0  ;;  %v264_v59 = vshll.u32 %v3273_v5, %v262_v17  ;;  %v265_v60 = vshrl.u32 %v247_v2, %v263_v4 }
  0x69   :  { %4855 = vst [vmem:[#allocation14_spill] sm:$0xff] %v3383_v3  ;;  %v457_v62 = vadd.s32 %v456_v7, %v452_v12  ;;  %v514_v20 = vand.u32 31, %v512_v56  ;;  %vm3389_vm13 = vcmp.le.f32.partialorder %v88_v10, 0.7853982  ;;  %v173_v28 = vsel %vm90_vm9, %v172_v58, %v171_v51 }
  0x6a   :  { %v269_v27 = vshll.u32 %v268_v37, 23  ;;  %v4783_v29 = vand.u32 2147483647, %v3322_v61  ;;  %v3397_v32 = vmul.f32 %v3139_v6, %v59_v24  ;;  %v3399_v31 = vsel %vm2840_vm12, 0, %v2839_v26 }
  0x6b   :  { %v458_v5 = vadd.s32 536870912, %v457_v62  ;;  %v515_v17 = vsub.s32 32, %v514_v20  ;;  %v3402_v46 = vmul.f32 %v3139_v6, %v60_v42  ;;  %v3405_v10 = vmul.f32 %v3139_v6, %v61_v50 }
  0x6c   :  { %4858 = vst [vmem:[#allocation15_spill] sm:$0xff] %v3397_v32  ;;  %v3408_v57 = vmul.f32 %v3139_v6, %v62_v52  ;;  %v3411_v51 = vmul.f32 %v3139_v6, %v63_v18  ;;  %v3416_v24 = vsel %vm3389_vm13, %v3142_v8, %v173_v28  ;;  %v266_v63 = vor.u32 %v265_v60, %v264_v59 }
  0x6d   :  { %v350_v38 = vadd.s32 %v3280_v30, %v3290_v33  ;;  %v3420_v42 = vshrl.u32 %v458_v5, 30  ;;  %v270_v53 = vor.u32 4788187, %v269_v27  ;;  %v370_v48 = vsub.s32 4294967266, %v3399_v31 }
  0x6e   :  { %v507_v50 = vand.u32 8388607, %v4783_v29  ;;  %v517_v52 = vshll.u32 %v4796_v39, %v514_v20  ;;  %v518_v26 = vshrl.u32 %v4794_v41, %v515_v17  ;;  %v520_v4 = vshll.u32 %v4794_v41, %v514_v20 }
  0x6f   :  { %v460_v2 = vshll.u32 %v3420_v42, 30  ;;  %v521_v12 = vshrl.u32 %v4792_v43, %v515_v17  ;;  %v513_v49 = vshrl.u32 %v512_v56, 5  ;;  %v523_v30 = vshll.u32 %v4792_v43, %v514_v20 }
  0x70   :  { %v524_v33 = vshrl.u32 %v4785_v45, %v515_v17  ;;  %v526_v15 = vshll.u32 %v4785_v45, %v514_v20  ;;  %v273_v18 = vcvt.s32.f32 %v266_v63  ;;  %v527_v37 = vshrl.u32 %v4789_v47, %v515_v17 }
  0x71   :  { %v3433_v58 = vsub.s32 %v457_v62, %v460_v2  ;;  %v529_v7 = vshll.u32 %v4789_v47, %v514_v20  ;;  %v366_v59 = vsub.s32 32, %v3399_v31  ;;  %v371_v60 = vadd.s32 127, %v370_v48 }
  0x72   :  { %v508_v28 = vor.u32 8388608, %v507_v50  ;;  %v530_v27 = vshrl.u32 %v4787_v55, %v515_v17  ;;  %v516_v5 = vshrl.u32 %v4796_v39, %v515_v17  ;;  %v519_v29 = vor.u32 %v518_v26, %v517_v52 }
  0x73   :  { %v463_v56 = vsub.s32 0, %v3433_v58  ;;  %v522_v35 = vor.u32 %v521_v12, %v520_v4  ;;  %v525_v45 = vor.u32 %v524_v33, %v523_v30  ;;  %v528_v63 = vor.u32 %v527_v37, %v526_v15 }
  0x74   :  { %v531_v62 = vor.u32 %v530_v27, %v529_v7  ;;  %vm532_vm14 = vcmp.lt.s32.totalorder %v513_v49, 1  ;;  %2996 = vcosq.f32 %v3416_v24  ;;  %v271_v2 = vand.u32 2147483647, %v270_v53 }
  0x75   :  { %v367_v20 = vshll.u32 %v3343_v34, %v3399_v31  ;;  %v2842_v48 = vmin.u32 %v463_v56, %v3433_v58  ;;  %v368_v50 = vshrl.u32 %v350_v38, %v366_v59  ;;  %vm534_vm15 = vcmp.lt.s32.totalorder %v513_v49, 3 }
  0x76   :  { %vm535_vm0 = vcmp.lt.s32.totalorder %v513_v49, 4  ;;  %v548_v55 = vshll.u32 %v508_v28, 8  ;;  %v372_v47 = vshll.u32 %v371_v60, 23  ;;  %vm533_vm1 = vcmp.lt.s32.totalorder %v513_v49, 2 }
  0x77   :  { %v537_v17 = vsel %vm535_vm0, %v525_v45, 2102212464  ;;  %v540_v52 = vsel %vm532_vm14, %v519_v29, %v522_v35  ;;  %v536_v26 = vsel %vm532_vm14, %v516_v5, %v519_v29  ;;  %v541_v4 = vsel %vm535_vm0, %v528_v63, 920167782 }
  0x78   :  { %v544_v12 = vsel %vm532_vm14, %v522_v35, %v525_v45  ;;  %v545_v30 = vsel %vm535_vm0, %v531_v62, 1326507024  ;;  %v465_v33 = vclz %v2842_v48  ;;  %v538_v15 = vsel %vm534_vm15, %v522_v35, %v537_v17 }
  0x79   :  { %v542_v53 = vsel %vm534_vm15, %v525_v45, %v541_v4  ;;  %v546_v37 = vsel %vm534_vm15, %v528_v63, %v545_v30  ;;  %v174_v34 = vsub.s32 4, %v3234_v14  ;;  %v274_v31 = vmul.f32 %v273_v18, %v271_v2 }
  0x7a   :  { %v543_v38 = vsel %vm533_vm1, %v540_v52, %v542_v53  ;;  %v547_v7 = vsel %vm533_vm1, %v544_v12, %v546_v37  ;;  %v369_v59 = vor.u32 %v368_v50, %v367_v20  ;;  %v373_v60 = vor.u32 4788187, %v372_v47 }
  0x7b   :  { %v3448_v28 = vmul.u32.u64.low %v548_v55, %v547_v7  ;;  %v3449_v27 = vmul.u32.u64.high %v548_v55, %v547_v7, %v3448_v28  ;;  %v539_v29 = vsel %vm533_vm1, %v536_v26, %v538_v15  ;;  %v606_v45 = vand.u32 2139095040, %v3383_v3 }
  0x7c   :  { %v3452_v56 = vmul.u32.u64.low %v548_v55, %v543_v38  ;;  %v3453_v5 = vmul.u32.u64.high %v548_v55, %v543_v38, %v3452_v56  ;;  %v3460_v35 = vmul.f32 %v3139_v6, %v64_v54  ;;  %v3465_v47 = vmul.f32 %v3139_v6, %v65_v21 }
  0x7d   :  { %v277_v18 = vsub.s32 4, %v3262_v44  ;;  %v2843_v49 = vadd.s32 4294967294, %v465_v33  ;;  %v175_v63 = vsel %vm90_vm9, %v174_v34, %v3234_v14  ;;  %vm3473_vm2 = vcmp.le.f32.partialorder %v191_v13, 0.7853982 }
  0x7e   :  { %vm193_vm3 = vcmp.lt.s32.totalorder %v3145_v9, 0  ;;  %v607_v25 = vshrl.u32 %v606_v45, 23  ;;  %v3478_v22 = vpop.eup %2996  ;;  %v275_v6 = vxor.u32 2147483648, %v274_v31  ;;  %v380_v54 = vsub.s32 4, %v3331_v23 }
  0x7f   :  { %4861 = vst [vmem:[#allocation16_spill] sm:$0xff] %v3478_v22  ;;  %v555_v21 = vmul.u32 %v548_v55, %v539_v29  ;;  %vm557_vm4 = vc.u32 %v3449_v27, %v3452_v56  ;;  %v374_v2 = vand.u32 2147483647, %v373_v60  ;;  %v376_v14 = vcvt.s32.f32 %v369_v59 }
  0x80   :  { %v558_v20 = vadd.s32 1, %v3453_v5  ;;  %v2849_v13 = vadd.s32 4294967169, %v607_v25  ;;  %v3486_v48 = vsel %vm3389_vm13, 0, %v175_v63  ;;  %v278_v50 = vsel %vm193_vm3, %v277_v18, %v3262_v44 }
  0x81   :  { %vm296_vm5 = vcmp.lt.s32.totalorder %v3149_v11, 0  ;;  %vm2844_vm6 = vcmp.lt.s32.totalorder %v2843_v49, 0  ;;  %v3493_v55 = vand.u32 3, %v3486_v48  ;;  %vm3497_vm7 = vcmp.le.f32.partialorder %v294_v19, 0.7853982 }
  0x82   :  { %v559_v36 = vsel %vm557_vm4, %v558_v20, %v3453_v5  ;;  %v613_v52 = vadd.s32 1, %v2849_v13  ;;  %v276_v26 = vsel %vm193_vm3, %v275_v6, %v274_v31  ;;  %v381_v44 = vsel %vm296_vm5, %v380_v54, %v3331_v23 }
  0x83   :  { %v560_v4 = vadd.s32 %v559_v36, %v555_v21  ;;  %v4791_v12 = vand.u32 2147483647, %v3383_v3  ;;  %v3510_v30 = vsel %vm3473_vm2, 0, %v278_v50  ;;  %v377_v19 = vmul.f32 %v376_v14, %v374_v2 }
  0x84   :  { %v3512_v33 = vsel %vm2844_vm6, 0, %v2843_v49  ;;  %vm614_vm8 = vcmp.gt.s32.totalorder %v613_v52, 0  ;;  %2998 = vsinq.f32 %v3416_v24  ;;  %v3516_v15 = vand.u32 3, %v3510_v30 }
  0x85   :  { %v561_v53 = vadd.s32 536870912, %v560_v4  ;;  %v615_v37 = vsel %vm614_vm8, %v613_v52, 0  ;;  %v3522_v34 = vsel %vm3473_vm2, %v3145_v9, %v276_v26  ;;  %v3526_v31 = vsel %vm3497_vm7, 0, %v381_v44 }
  0x86   :  { %4864 = vst [vmem:[#allocation17_spill] sm:$0xff] %v3526_v31  ;;  %v617_v38 = vand.u32 31, %v615_v37  ;;  %v453_v24 = vadd.s32 %v3361_v40, %v3369_v0  ;;  %v473_v7 = vsub.s32 4294967266, %v3512_v33  ;;  %v610_v60 = vand.u32 8388607, %v4791_v12 }
  0x87   :  { %v3531_v59 = vshrl.u32 %v561_v53, 30  ;;  %v378_v28 = vxor.u32 2147483648, %v377_v19  ;;  %v469_v29 = vsub.s32 32, %v3512_v33  ;;  %v709_v45 = vand.u32 2139095040, %v3397_v32 }
  0x88   :  { %v618_v5 = vsub.s32 32, %v617_v38  ;;  %v620_v49 = vshll.u32 %v4796_v39, %v617_v38  ;;  %v623_v63 = vshll.u32 %v4794_v41, %v617_v38  ;;  %v626_v40 = vshll.u32 %v4792_v43, %v617_v38 }
  0x89   :  { %v563_v18 = vshll.u32 %v3531_v59, 30  ;;  %v4865_v25 = vmov 2102212464   ;;  %v474_v21 = vadd.s32 127, %v473_v7  ;;  %v611_v14 = vor.u32 8388608, %v610_v60 }
  0x8a   :  { %v621_v0 = vshrl.u32 %v4794_v41, %v618_v5  ;;  %v624_v62 = vshrl.u32 %v4792_v43, %v618_v5  ;;  %v627_v6 = vshrl.u32 %v4865_v25, %v618_v5  ;;  %v629_v54 = vshll.u32 %v4865_v25, %v617_v38 }
  0x8b   :  { %v3545_v2 = vsub.s32 %v560_v4, %v563_v18  ;;  %v4866_v20 = vmov 920167782   ;;  %v379_v50 = vsel %vm296_vm5, %v378_v28, %v377_v19  ;;  %v470_v36 = vshll.u32 %v3433_v58, %v3512_v33 }
  0x8c   :  { %v630_v13 = vshrl.u32 %v4866_v20, %v618_v5  ;;  %v616_v52 = vshrl.u32 %v615_v37, 5  ;;  %v710_v26 = vshrl.u32 %v709_v45, 23  ;;  %v471_v44 = vshrl.u32 %v453_v24, %v469_v29 }
  0x8d   :  { %v566_v53 = vsub.s32 0, %v3545_v2  ;;  %v622_v12 = vor.u32 %v621_v0, %v620_v49  ;;  %v625_v43 = vor.u32 %v624_v62, %v623_v63  ;;  %v628_v41 = vor.u32 %v627_v6, %v626_v40 }
  0x8e   :  { %v631_v7 = vor.u32 %v630_v13, %v629_v54  ;;  %v632_v4 = vshll.u32 %v4866_v20, %v617_v38  ;;  %v4867_v60 = vmov 1326507024   ;;  %v3555_v23 = vpop.eup %2998  ;;  %vm186_vm9 = vcmp.eq.s32.totalorder %v3493_v55, 2 }
  0x8f   :  { %v633_v18 = vshrl.u32 %v4867_v60, %v618_v5  ;;  %v475_v19 = vshll.u32 %v474_v21, 23  ;;  %v2846_v58 = vmin.u32 %v566_v53, %v3545_v2  ;;  %v619_v33 = vshrl.u32 %v4796_v39, %v618_v5 }
  0x90   :  { %v651_v37 = vshll.u32 %v611_v14, 8  ;;  %vm183_vm10 = vcmp.eq.s32.totalorder %v3493_v55, 0  ;;  %vm635_vm11 = vcmp.lt.s32.totalorder %v616_v52, 1  ;;  %vm637_vm12 = vcmp.lt.s32.totalorder %v616_v52, 3 }
  0x91   :  { %v634_v24 = vor.u32 %v633_v18, %v632_v4  ;;  %v2853_v28 = vadd.s32 4294967169, %v710_v26  ;;  %v568_v29 = vclz %v2846_v58  ;;  %vm636_vm13 = vcmp.lt.s32.totalorder %v616_v52, 2 }
  0x92   :  { %vm638_vm14 = vcmp.lt.s32.totalorder %v616_v52, 4  ;;  %v643_v38 = vsel %vm635_vm11, %v622_v12, %v625_v43  ;;  %v647_v63 = vsel %vm635_vm11, %v625_v43, %v628_v41  ;;  %v639_v0 = vsel %vm635_vm11, %v619_v33, %v622_v12 }
  0x93   :  { %v640_v45 = vsel %vm638_vm14, %v628_v41, 2102212464  ;;  %v644_v49 = vsel %vm638_vm14, %v631_v7, 920167782  ;;  %v648_v40 = vsel %vm638_vm14, %v634_v24, 1326507024  ;;  %v472_v53 = vor.u32 %v471_v44, %v470_v36 }
  0x94   :  { %v641_v62 = vsel %vm637_vm12, %v625_v43, %v640_v45  ;;  %v645_v6 = vsel %vm637_vm12, %v628_v41, %v644_v49  ;;  %v649_v54 = vsel %vm637_vm12, %v631_v7, %v648_v40  ;;  %v2847_v5 = vadd.s32 4294967294, %v568_v29 }
  0x95   :  { %v646_v21 = vsel %vm636_vm13, %v643_v38, %v645_v6  ;;  %v650_v14 = vsel %vm636_vm13, %v647_v63, %v649_v54  ;;  %v716_v13 = vadd.s32 1, %v2853_v28  ;;  %v476_v26 = vor.u32 4788187, %v475_v19 }
  0x96   :  { %v3563_v4 = vmul.u32.u64.low %v651_v37, %v650_v14  ;;  %v3564_v18 = vmul.u32.u64.high %v651_v37, %v650_v14, %v3563_v4  ;;  %v642_v58 = vsel %vm636_vm13, %v639_v0, %v641_v62  ;;  %v4799_v41 = vxor.u32 2147483648, %v3555_v23 }
  0x97   :  { %v3567_v39 = vmul.u32.u64.low %v651_v37, %v646_v21  ;;  %v3568_v1 = vmul.u32.u64.high %v651_v37, %v646_v21, %v3567_v39  ;;  %vm717_vm15 = vcmp.gt.s32.totalorder %v716_v13, 0  ;;  %3000 = vcosq.f32 %v3522_v34 }
  0x98   :  { %v3574_v43 = vand.u32 3, %v3526_v31  ;;  %v718_v12 = vsel %vm717_vm15, %v716_v13, 0  ;;  %3002 = vsinq.f32 %v3522_v34  ;;  %v382_v36 = vsel %vm3497_vm7, %v3149_v11, %v379_v50 }
  0x99   :  { %vm2848_vm0 = vcmp.lt.s32.totalorder %v2847_v5, 0  ;;  %v720_v52 = vand.u32 31, %v718_v12  ;;  %v477_v44 = vand.u32 2147483647, %v476_v26  ;;  %v479_v7 = vcvt.s32.f32 %v472_v53 }
  0x9a   :  { %v658_v19 = vmul.u32 %v651_v37, %v642_v58  ;;  %v4800_v33 = vand.u32 2147483647, %v3397_v32  ;;  %v4868_v24 = vxor.u32 2147483648, %v3478_v22  ;;  %vm660_vm1 = vc.u32 %v3564_v18, %v3567_v39 }
  0x9b   :  { %v661_v17 = vadd.s32 1, %v3568_v1  ;;  %v721_v34 = vsub.s32 32, %v720_v52  ;;  %v185_v50 = vsel %vm183_vm10, %v3478_v22, %v4799_v41  ;;  %3004 = vcosq.f32 %v382_v36 }
  0x9c   :  { %v3586_v28 = vsel %vm186_vm9, %v4868_v24, %v3555_v23  ;;  %vm399_vm2 = vcmp.lt.s32.totalorder %v3239_v16, 0  ;;  %v3597_v37 = vsel %vm2848_vm0, 0, %v2847_v5  ;;  %v4869_v29 = vmov 683565275  }
  0x9d   :  { %v723_v38 = vshll.u32 %v4869_v29, %v720_v52  ;;  %vm182_vm3 = vcmp.lt.s32.totalorder %v3493_v55, 2  ;;  %3006 = vsinq.f32 %v382_v36  ;;  %v556_v45 = vadd.s32 %v3452_v56, %v3449_v27 }
  0x9e   :  { %v662_v49 = vsel %vm660_vm1, %v661_v17, %v3568_v1  ;;  %v4870_v63 = vmov 2475754826   ;;  %v480_v0 = vmul.f32 %v479_v7, %v477_v44  ;;  %v713_v6 = vand.u32 8388607, %v4800_v33 }
  0x9f   :  { %v724_v40 = vshrl.u32 %v4870_v63, %v721_v34  ;;  %v663_v62 = vadd.s32 %v662_v49, %v658_v19  ;;  %v3607_v54 = vshrl.u32 %v718_v12, 5  ;;  %v4871_v5 = vand.u32 2147483647, %v3239_v16 }
  0xa0   :  { %v576_v14 = vsub.s32 4294967266, %v3597_v37  ;;  %v726_v27 = vshll.u32 %v4870_v63, %v720_v52  ;;  %v4874_v1 = vmov 2131351028   ;;  %v730_v4 = vshrl.u32 %v4865_v25, %v721_v34 }
  0xa1   :  { %vm3611_vm4 = vcmp.le.f32.partialorder %v4871_v5, 0.7853982  ;;  %v727_v56 = vshrl.u32 %v4874_v1, %v721_v34  ;;  %v729_v13 = vshll.u32 %v4874_v1, %v720_v52  ;;  %v664_v53 = vadd.s32 536870912, %v663_v62  ;;  %v3624_v19 = vpop.eup %3000 }
  0xa2   :  { %v725_v26 = vor.u32 %v724_v40, %v723_v38  ;;  %v732_v58 = vshll.u32 %v4865_v25, %v720_v52  ;;  %v733_v36 = vshrl.u32 %v4866_v20, %v721_v34  ;;  %v735_v44 = vshll.u32 %v4866_v20, %v720_v52  ;;  %4875 = vst [vmem:[#allocation18_spill] sm:$0xff] %v3624_v19  ;;  %v3632_v49 = vpop.eup %3002 }
  0xa3   :  { %v728_v12 = vor.u32 %v727_v56, %v726_v27  ;;  %v736_v7 = vshrl.u32 %v4867_v60, %v721_v34  ;;  %vm180_vm5 = vweird.f32 %v3142_v8  ;;  %vm289_vm6 = vcmp.eq.s32.totalorder %v3516_v15, 2  ;;  %4876 = vst [vmem:[#allocation19_spill] sm:$0xff] %v3632_v49 }
  0xa4   :  { %v572_v24 = vsub.s32 32, %v3597_v37  ;;  %v3629_v17 = vshrl.u32 %v664_v53, 30  ;;  %v714_v38 = vor.u32 8388608, %v713_v6  ;;  %vm738_vm7 = vcmp.lt.s32.totalorder %v3607_v54, 1 }
  0xa5   :  { %vm286_vm8 = vcmp.eq.s32.totalorder %v3516_v15, 0  ;;  %v481_v52 = vxor.u32 2147483648, %v480_v0  ;;  %v577_v40 = vadd.s32 127, %v576_v14  ;;  %v731_v5 = vor.u32 %v730_v4, %v729_v13  ;;  %v3644_v14 = vpop.eup %3004 }
  0xa6   :  { %v734_v27 = vor.u32 %v733_v36, %v732_v58  ;;  %v666_v56 = vshll.u32 %v3629_v17, 30  ;;  %v722_v41 = vshrl.u32 %v4869_v29, %v721_v34  ;;  %vm740_vm9 = vcmp.lt.s32.totalorder %v3607_v54, 3  ;;  %4877 = vst [vmem:[#allocation20_spill] sm:$0xff] %v3644_v14 }
  0xa7   :  { %vm741_vm10 = vcmp.lt.s32.totalorder %v3607_v54, 4  ;;  %v737_v53 = vor.u32 %v736_v7, %v735_v44  ;;  %vm739_vm11 = vcmp.lt.s32.totalorder %v3607_v54, 2  ;;  %v746_v6 = vsel %vm738_vm7, %v725_v26, %v728_v12  ;;  %v3652_v36 = vpop.eup %3006 }
  0xa8   :  { %v747_v33 = vsel %vm741_vm10, %v734_v27, 920167782  ;;  %v573_v13 = vshll.u32 %v3545_v2, %v3597_v37  ;;  %v574_v4 = vshrl.u32 %v556_v45, %v572_v24  ;;  %v3648_v34 = vsub.s32 %v663_v62, %v666_v56  ;;  %4878 = vst [vmem:[#allocation21_spill] sm:$0xff] %v3652_v36 }
  0xa9   :  { %v743_v58 = vsel %vm741_vm10, %v731_v5, 2102212464  ;;  %v482_v44 = vsel %vm399_vm2, %v481_v52, %v480_v0  ;;  %v578_v7 = vshll.u32 %v577_v40, 23  ;;  %v748_v31 = vsel %vm740_vm9, %v731_v5, %v747_v33 }
  0xaa   :  { %v754_v22 = vshll.u32 %v714_v38, 8  ;;  %v189_v2 = vsel %vm182_vm3, %v185_v50, %v3586_v28  ;;  %v4804_v37 = vxor.u32 2147483648, %v3624_v19  ;;  %v669_v45 = vsub.s32 0, %v3648_v34 }
  0xab   :  { %v749_v62 = vsel %vm739_vm11, %v746_v6, %v748_v31  ;;  %v742_v24 = vsel %vm738_vm7, %v722_v41, %v725_v26  ;;  %v744_v0 = vsel %vm740_vm9, %v728_v12, %v743_v58  ;;  %v750_v33 = vsel %vm738_vm7, %v728_v12, %v731_v5 }
  0xac   :  { %v751_v55 = vsel %vm741_vm10, %v737_v53, 1326507024  ;;  %v4805_v28 = vxor.u32 2147483648, %v3632_v49  ;;  %v485_v50 = vsel %vm3611_vm4, %v3239_v16, %v482_v44  ;;  %v575_v38 = vor.u32 %v574_v4, %v573_v13 }
  0xad   :  { %v2850_v31 = vmin.u32 %v669_v45, %v3648_v34  ;;  %v579_v52 = vor.u32 4788187, %v578_v7  ;;  %v752_v41 = vsel %vm740_vm9, %v734_v27, %v751_v55  ;;  %vm285_vm12 = vcmp.lt.s32.totalorder %v3516_v15, 2 }
  0xae   :  { %v3680_v26 = vmul.u32.u64.low %v754_v22, %v749_v62  ;;  %v3681_v40 = vmul.u32.u64.high %v754_v22, %v749_v62, %v3680_v26  ;;  %v745_v5 = vsel %vm739_vm11, %v742_v24, %v744_v0  ;;  %v753_v56 = vsel %vm739_vm11, %v750_v33, %v752_v41 }
  0xaf   :  { %v671_v12 = vclz %v2850_v31  ;;  %v812_v53 = vand.u32 2139095040, %v3402_v46  ;;  %v3692_v6 = vsel %vm180_vm5, nan, %v189_v2  ;;  %v291_v27 = vsel %vm289_vm6, %v4804_v37, %v3632_v49 }
  0xb0   :  { %4879 = vst [vmem:[#allocation22_spill] sm:$0xff] %v3692_v6  ;;  %vm389_vm13 = vcmp.eq.s32.totalorder %v3574_v43, 0  ;;  %vm392_vm14 = vcmp.eq.s32.totalorder %v3574_v43, 2  ;;  %v3701_v13 = vmul.u32.u64.low %v754_v22, %v753_v56  ;;  %v3702_v4 = vmul.u32.u64.high %v754_v22, %v753_v56, %v3701_v13 }
  0xb1   :  { %v288_v54 = vsel %vm286_vm8, %v3624_v19, %v4805_v28  ;;  %3008 = vcosq.f32 %v485_v50  ;;  %v2851_v58 = vadd.s32 4294967294, %v671_v12  ;;  %v813_v44 = vshrl.u32 %v812_v53, 23 }
  0xb2   :  { %v483_v7 = vsub.s32 4, %v3420_v42  ;;  %3010 = vsinq.f32 %v485_v50  ;;  %vm502_vm15 = vcmp.lt.s32.totalorder %v3322_v61, 0  ;;  %v761_v2 = vmul.u32 %v754_v22, %v745_v5 }
  0xb3   :  { %v764_v45 = vadd.s32 1, %v3681_v40  ;;  %v580_v62 = vand.u32 2147483647, %v579_v52  ;;  %v582_v24 = vcvt.s32.f32 %v575_v38  ;;  %vm2852_vm0 = vcmp.lt.s32.totalorder %v2851_v58, 0 }
  0xb4   :  { %v2857_v0 = vadd.s32 4294967169, %v813_v44  ;;  %v659_v33 = vadd.s32 %v3567_v39, %v3564_v18  ;;  %v674_v55 = vsel %vm2852_vm0, 0, %v2851_v58  ;;  %vm763_vm1 = vc.u32 %v3702_v4, %v3680_v26 }
  0xb5   :  { %v4807_v31 = vand.u32 2147483647, %v3402_v46  ;;  %v675_v41 = vsub.s32 32, %v674_v55  ;;  %v679_v50 = vsub.s32 4294967266, %v674_v55  ;;  %v765_v12 = vsel %vm763_vm1, %v764_v45, %v3681_v40 }
  0xb6   :  { %v915_v22 = vand.u32 2139095040, %v3405_v10  ;;  %v484_v38 = vsel %vm399_vm2, %v483_v7, %v3420_v42  ;;  %v766_v5 = vadd.s32 %v765_v12, %v761_v2  ;;  %v819_v39 = vadd.s32 1, %v2857_v0 }
  0xb7   :  { %v4806_v18 = vxor.u32 2147483648, %v3652_v36  ;;  %v583_v56 = vmul.f32 %v582_v24, %v580_v62  ;;  %v586_v53 = vsub.s32 4, %v3531_v59  ;;  %v680_v13 = vadd.s32 127, %v679_v50 }
  0xb8   :  { %v676_v58 = vshll.u32 %v3648_v34, %v674_v55  ;;  %v677_v44 = vshrl.u32 %v659_v33, %v675_v41  ;;  %v767_v40 = vadd.s32 536870912, %v766_v5  ;;  %vm820_vm3 = vcmp.gt.s32.totalorder %v819_v39, 0 }
  0xb9   :  { %v681_v45 = vshll.u32 %v680_v13, 23  ;;  %v816_v37 = vand.u32 8388607, %v4807_v31  ;;  %v821_v28 = vsel %vm820_vm3, %v819_v39, 0  ;;  %v916_v52 = vshrl.u32 %v915_v22, 23 }
  0xba   :  { %v3730_v42 = vsel %vm285_vm12, %v288_v54, %v291_v27  ;;  %v3734_v7 = vsel %vm3611_vm4, 0, %v484_v38  ;;  %v3736_v2 = vshrl.u32 %v767_v40, 30  ;;  %v823_v34 = vand.u32 31, %v821_v28 }
  0xbb   :  { %v3738_v62 = vpop.eup %3008  ;;  %v3745_v24 = vsel %vm389_vm13, %v3644_v14, %v4806_v18  ;;  %v4880_v15 = vxor.u32 2147483648, %v3644_v14  ;;  %v3755_v27 = vand.u32 3, %v3734_v7  ;;  %v3760_v54 = vsel %vm502_vm15, %v586_v53, %v3531_v59 }
  0xbc   :  { %v3762_v0 = vpop.eup %3010  ;;  %v678_v33 = vor.u32 %v677_v44, %v676_v58  ;;  %v682_v55 = vor.u32 4788187, %v681_v45  ;;  %v769_v41 = vshll.u32 %v3736_v2, 30  ;;  %v824_v50 = vsub.s32 32, %v823_v34 }
  0xbd   :  { %v3752_v21 = vsel %vm392_vm14, %v4880_v15, %v3652_v36  ;;  %v584_v12 = vxor.u32 2147483648, %v583_v56  ;;  %v817_v22 = vor.u32 8388608, %v816_v37  ;;  %v3765_v38 = vshrl.u32 %v821_v28, 5 }
  0xbe   :  { %v2861_v39 = vadd.s32 4294967169, %v916_v52  ;;  %v3767_v13 = vsub.s32 %v766_v5, %v769_v41  ;;  %v826_v40 = vshll.u32 %v4869_v29, %v823_v34  ;;  %v827_v15 = vshrl.u32 %v4870_v63, %v824_v50 }
  0xbf   :  { %v829_v59 = vshll.u32 %v4870_v63, %v823_v34  ;;  %v830_v53 = vshrl.u32 %v4874_v1, %v824_v50  ;;  %v832_v58 = vshll.u32 %v4874_v1, %v823_v34  ;;  %v833_v44 = vshrl.u32 %v4865_v25, %v824_v50 }
  0xc0   :  { %v835_v45 = vshll.u32 %v4865_v25, %v823_v34  ;;  %v683_v37 = vand.u32 2147483647, %v682_v55  ;;  %v685_v28 = vcvt.s32.f32 %v678_v33  ;;  %v772_v52 = vsub.s32 0, %v3767_v13 }
  0xc1   :  { %v836_v5 = vshrl.u32 %v4866_v20, %v824_v50  ;;  %vm388_vm2 = vcmp.lt.s32.totalorder %v3574_v43, 2  ;;  %v585_v31 = vsel %vm502_vm15, %v584_v12, %v583_v56  ;;  %v838_v6 = vshll.u32 %v4866_v20, %v823_v34 }
  0xc2   :  { %vm492_vm4 = vcmp.eq.s32.totalorder %v3755_v27, 0  ;;  %vm495_vm6 = vcmp.eq.s32.totalorder %v3755_v27, 2  ;;  %v4881_v33 = vand.u32 2147483647, %v3322_v61  ;;  %v2854_v14 = vmin.u32 %v772_v52, %v3767_v13 }
  0xc3   :  { %v825_v41 = vshrl.u32 %v4869_v29, %v824_v50  ;;  %v828_v18 = vor.u32 %v827_v15, %v826_v40  ;;  %v831_v36 = vor.u32 %v830_v53, %v829_v59  ;;  %vm605_vm8 = vcmp.lt.s32.totalorder %v3383_v3, 0 }
  0xc4   :  { %vm3788_vm7 = vcmp.le.f32.partialorder %v4881_v33, 0.7853982  ;;  %v834_v56 = vor.u32 %v833_v44, %v832_v58  ;;  %v837_v34 = vor.u32 %v836_v5, %v835_v45  ;;  %v839_v12 = vshrl.u32 %v4867_v60, %v824_v50 }
  0xc5   :  { %vm841_vm9 = vcmp.lt.s32.totalorder %v3765_v38, 1  ;;  %v686_v19 = vmul.f32 %v685_v28, %v683_v37  ;;  %v774_v49 = vclz %v2854_v14  ;;  %v857_v33 = vshll.u32 %v817_v22, 8 }
  0xc6   :  { %v922_v8 = vadd.s32 1, %v2861_v39  ;;  %vm283_vm10 = vweird.f32 %v3145_v9  ;;  %vm386_vm11 = vweird.f32 %v3149_v11  ;;  %v840_v52 = vor.u32 %v839_v12, %v838_v6 }
  0xc7   :  { %vm842_vm12 = vcmp.lt.s32.totalorder %v3765_v38, 2  ;;  %vm843_vm13 = vcmp.lt.s32.totalorder %v3765_v38, 3  ;;  %vm844_vm14 = vcmp.lt.s32.totalorder %v3765_v38, 4  ;;  %vm491_vm15 = vcmp.lt.s32.totalorder %v3755_v27, 2 }
  0xc8   :  { %v2855_v50 = vadd.s32 4294967294, %v774_v49  ;;  %v845_v40 = vsel %vm841_vm9, %v825_v41, %v828_v18  ;;  %v846_v14 = vsel %vm844_vm14, %v834_v56, 2102212464  ;;  %v849_v22 = vsel %vm841_vm9, %v828_v18, %v831_v36 }
  0xc9   :  { %v4884_v39 = vand.u32 2147483647, %v3383_v3  ;;  %v847_v15 = vsel %vm843_vm13, %v831_v36, %v846_v14  ;;  %v850_v59 = vsel %vm844_vm14, %v837_v34, 920167782  ;;  %v853_v53 = vsel %vm841_vm9, %v831_v36, %v834_v56 }
  0xca   :  { %v854_v58 = vsel %vm844_vm14, %v840_v52, 1326507024  ;;  %v762_v49 = vadd.s32 %v3680_v26, %v3702_v4  ;;  %vm2856_vm1 = vcmp.lt.s32.totalorder %v2855_v50, 0  ;;  %v851_v44 = vsel %vm843_vm13, %v834_v56, %v850_v59 }
  0xcb   :  { %vm3809_vm0 = vcmp.le.f32.partialorder %v4884_v39, 0.7853982  ;;  %v855_v45 = vsel %vm843_vm13, %v837_v34, %v854_v58  ;;  %v687_v37 = vxor.u32 2147483648, %v686_v19  ;;  %v777_v18 = vsel %vm2856_vm1, 0, %v2855_v50 }
  0xcc   :  { %v852_v28 = vsel %vm842_vm12, %v849_v22, %v851_v44  ;;  %v856_v5 = vsel %vm842_vm12, %v853_v53, %v855_v45  ;;  %v778_v41 = vsub.s32 32, %v777_v18  ;;  %v782_v12 = vsub.s32 4294967266, %v777_v18 }
  0xcd   :  { %v848_v36 = vsel %vm842_vm12, %v845_v40, %v847_v15  ;;  %vm923_vm3 = vcmp.gt.s32.totalorder %v922_v8, 0  ;;  %v3823_v52 = vmul.u32.u64.low %v857_v33, %v856_v5  ;;  %v3824_v14 = vmul.u32.u64.high %v857_v33, %v856_v5, %v3823_v52 }
  0xce   :  { %v3826_v26 = vmul.u32.u64.low %v857_v33, %v852_v28  ;;  %v3827_v4 = vmul.u32.u64.high %v857_v33, %v852_v28, %v3826_v26  ;;  %v395_v56 = vsel %vm388_vm2, %v3745_v24, %v3752_v21  ;;  %v3837_v34 = vsel %vm3788_vm7, 0, %v3760_v54 }
  0xcf   :  { %v783_v38 = vadd.s32 127, %v782_v12  ;;  %v924_v50 = vsel %vm923_vm3, %v922_v8, 0  ;;  %v4887_v40 = vxor.u32 2147483648, %v3762_v0  ;;  %v4888_v39 = vxor.u32 2147483648, %v3738_v62 }
  0xd0   :  { %v588_v24 = vsel %vm3788_vm7, %v3322_v61, %v585_v31  ;;  %v926_v21 = vand.u32 31, %v924_v50  ;;  %v688_v8 = vsel %vm605_vm8, %v687_v37, %v686_v19  ;;  %v779_v54 = vshll.u32 %v3767_v13, %v777_v18 }
  0xd1   :  { %v494_v22 = vsel %vm492_vm4, %v3738_v62, %v4887_v40  ;;  %v497_v43 = vsel %vm495_vm6, %v4888_v39, %v3762_v0  ;;  %v864_v15 = vmul.u32 %v857_v33, %v848_v36  ;;  %v4817_v59 = vand.u32 2147483647, %v3405_v10 }
  0xd2   :  { %v780_v53 = vshrl.u32 %v762_v49, %v778_v41  ;;  %v784_v58 = vshll.u32 %v783_v38, 23  ;;  %vm866_vm2 = vc.u32 %v3824_v14, %v3826_v26  ;;  %v867_v44 = vadd.s32 1, %v3827_v4 }
  0xd3   :  { %v3862_v31 = vsel %vm283_vm10, nan, %v3730_v42  ;;  %v3866_v19 = vsel %vm386_vm11, nan, %v395_v56  ;;  %v3869_v13 = vand.u32 3, %v3837_v34  ;;  %v927_v55 = vsub.s32 32, %v926_v21 }
  0xd4   :  { %4889 = vst [vmem:[#allocation23_spill] sm:$0xff] %v3862_v31  ;;  %4890 = vst [vmem:[#allocation24_spill] sm:$0xff] %v3866_v19  ;;  %v3873_v33 = vsel %vm491_vm15, %v494_v22, %v497_v43  ;;  %3012 = vcosq.f32 %v588_v24  ;;  %v689_v49 = vsub.s32 4, %v3629_v17  ;;  %v868_v45 = vsel %vm866_vm2, %v867_v44, %v3827_v4 }
  0xd5   :  { %3014 = vsinq.f32 %v588_v24  ;;  %v691_v42 = vsel %vm3809_vm0, %v3383_v3, %v688_v8  ;;  %v869_v37 = vadd.s32 %v868_v45, %v864_v15  ;;  %v919_v18 = vand.u32 8388607, %v4817_v59 }
  0xd6   :  { %v781_v28 = vor.u32 %v780_v53, %v779_v54  ;;  %v785_v5 = vor.u32 4788187, %v784_v58  ;;  %v3882_v41 = vshrl.u32 %v924_v50, 5  ;;  %v929_v27 = vshll.u32 %v4869_v29, %v926_v21 }
  0xd7   :  { %v870_v12 = vadd.s32 536870912, %v869_v37  ;;  %v930_v36 = vshrl.u32 %v4870_v63, %v927_v55  ;;  %v932_v52 = vshll.u32 %v4870_v63, %v926_v21  ;;  %v933_v4 = vshrl.u32 %v4874_v1, %v927_v55 }
  0xd8   :  { %v935_v56 = vshll.u32 %v4874_v1, %v926_v21  ;;  %v936_v38 = vshrl.u32 %v4865_v25, %v927_v55  ;;  %v938_v40 = vshll.u32 %v4865_v25, %v926_v21  ;;  %v939_v22 = vshrl.u32 %v4866_v20, %v927_v55 }
  0xd9   :  { %v690_v50 = vsel %vm605_vm8, %v689_v49, %v3629_v17  ;;  %v3895_v39 = vshrl.u32 %v870_v12, 30  ;;  %v920_v43 = vor.u32 8388608, %v919_v18  ;;  %v941_v24 = vshll.u32 %v4866_v20, %v926_v21 }
  0xda   :  { %3016 = vcosq.f32 %v691_v42  ;;  %v786_v8 = vand.u32 2147483647, %v785_v5  ;;  %v788_v54 = vcvt.s32.f32 %v781_v28  ;;  %v942_v15 = vshrl.u32 %v4867_v60, %v927_v55 }
  0xdb   :  { %vm4830_vm4 = vweird.f32 %v3239_v16  ;;  %v872_v53 = vshll.u32 %v3895_v39, 30  ;;  %v931_v58 = vor.u32 %v930_v36, %v929_v27  ;;  %v934_v44 = vor.u32 %v933_v4, %v932_v52 }
  0xdc   :  { %v940_v45 = vor.u32 %v939_v22, %v938_v40  ;;  %v937_v59 = vor.u32 %v936_v38, %v935_v56  ;;  %v943_v19 = vor.u32 %v942_v15, %v941_v24  ;;  %vm944_vm6 = vcmp.lt.s32.totalorder %v3882_v41, 1 }
  0xdd   :  { %vm947_vm7 = vcmp.lt.s32.totalorder %v3882_v41, 4  ;;  %3018 = vsinq.f32 %v691_v42  ;;  %vm708_vm8 = vcmp.lt.s32.totalorder %v3397_v32, 0  ;;  %v3904_v17 = vsub.s32 %v869_v37, %v872_v53 }
  0xde   :  { %v928_v21 = vshrl.u32 %v4869_v29, %v927_v55  ;;  %vm946_vm9 = vcmp.lt.s32.totalorder %v3882_v41, 3  ;;  %v3908_v49 = vpop.eup %3012  ;;  %vm595_vm12 = vcmp.eq.s32.totalorder %v3869_v13, 0  ;;  %v789_v18 = vmul.f32 %v788_v54, %v786_v8 }
  0xdf   :  { %v949_v28 = vsel %vm947_vm7, %v937_v59, 2102212464  ;;  %v960_v5 = vshll.u32 %v920_v43, 8  ;;  %v1018_v27 = vand.u32 2139095040, %v3408_v57  ;;  %v3914_v42 = vpop.eup %3014  ;;  %v875_v37 = vsub.s32 0, %v3904_v17 }
  0xe0   :  { %vm945_vm13 = vcmp.lt.s32.totalorder %v3882_v41, 2  ;;  %v952_v55 = vsel %vm944_vm6, %v931_v58, %v934_v44  ;;  %v953_v12 = vsel %vm947_vm7, %v940_v45, 920167782  ;;  %v3924_v36 = vsel %vm3809_vm0, 0, %v690_v50 }
  0xe1   :  { %v4891_v52 = vand.u32 2147483647, %v3397_v32  ;;  %v954_v56 = vsel %vm946_vm9, %v937_v59, %v953_v12  ;;  %v956_v38 = vsel %vm944_vm6, %v934_v44, %v937_v59  ;;  %v957_v40 = vsel %vm947_vm7, %v943_v19, 1326507024 }
  0xe2   :  { %vm594_vm15 = vcmp.lt.s32.totalorder %v3869_v13, 2  ;;  %v3940_v6 = vand.u32 3, %v3924_v36  ;;  %v2858_v22 = vmin.u32 %v875_v37, %v3904_v17  ;;  %v948_v50 = vsel %vm944_vm6, %v928_v21, %v931_v58 }
  0xe3   :  { %vm3928_vm14 = vcmp.le.f32.partialorder %v4891_v52, 0.7853982  ;;  %v950_v43 = vsel %vm946_vm9, %v934_v44, %v949_v28  ;;  %v790_v24 = vxor.u32 2147483648, %v789_v18  ;;  %v955_v59 = vsel %vm945_vm13, %v952_v55, %v954_v56 }
  0xe4   :  { %v958_v19 = vsel %vm946_vm9, %v940_v45, %v957_v40  ;;  %v1019_v8 = vshrl.u32 %v1018_v27, 23  ;;  %v877_v54 = vclz %v2858_v22  ;;  %v3957_v58 = vpop.eup %3016  ;;  %v951_v44 = vsel %vm945_vm13, %v948_v50, %v950_v43 }
  0xe5   :  { %v959_v15 = vsel %vm945_vm13, %v956_v38, %v958_v19  ;;  %v3953_v53 = vmul.u32.u64.low %v960_v5, %v955_v59  ;;  %v3954_v37 = vmul.u32.u64.high %v960_v5, %v955_v59, %v3953_v53  ;;  %4894 = vst [vmem:[#allocation25_spill] sm:$0xff] %v3957_v58  ;;  %v4821_v45 = vxor.u32 2147483648, %v3914_v42 }
  0xe6   :  { %v3961_v21 = vmul.u32.u64.low %v960_v5, %v959_v15  ;;  %v3962_v28 = vmul.u32.u64.high %v960_v5, %v959_v15, %v3961_v21  ;;  %v2865_v55 = vadd.s32 4294967169, %v1019_v8  ;;  %vm598_vm0 = vcmp.eq.s32.totalorder %v3869_v13, 2 }
  0xe7   :  { %v4818_v27 = vxor.u32 2147483648, %v3908_v49  ;;  %v2859_v12 = vadd.s32 4294967294, %v877_v54  ;;  %v3970_v52 = vsel %vm4830_vm4, nan, %v3873_v33  ;;  %vm698_vm1 = vcmp.eq.s32.totalorder %v3940_v6, 0  ;;  %v3974_v38 = vpop.eup %3018 }
  0xe8   :  { %4895 = vst [vmem:[#allocation26_spill] sm:$0xff] %v3970_v52  ;;  %v792_v41 = vsub.s32 4, %v3736_v2  ;;  %v1025_v56 = vadd.s32 1, %v2865_v55  ;;  %4896 = vst [vmem:[#allocation27_spill] sm:$0xff] %v3974_v38  ;;  %vm701_vm3 = vcmp.eq.s32.totalorder %v3940_v6, 2  ;;  %v967_v40 = vmul.u32 %v960_v5, %v951_v44 }
  0xe9   :  { %vm2860_vm2 = vcmp.lt.s32.totalorder %v2859_v12, 0  ;;  %v970_v22 = vadd.s32 1, %v3954_v37  ;;  %v791_v50 = vsel %vm708_vm8, %v790_v24, %v789_v18  ;;  %v865_v33 = vadd.s32 %v3826_v26, %v3824_v14 }
  0xea   :  { %v880_v43 = vsel %vm2860_vm2, 0, %v2859_v12  ;;  %vm969_vm6 = vc.u32 %v3962_v28, %v3953_v53  ;;  %v597_v59 = vsel %vm595_vm12, %v3908_v49, %v4821_v45  ;;  %v600_v5 = vsel %vm598_vm0, %v4818_v27, %v3914_v42 }
  0xeb   :  { %v881_v18 = vsub.s32 32, %v880_v43  ;;  %v885_v24 = vsub.s32 4294967266, %v880_v43  ;;  %v4819_v14 = vxor.u32 2147483648, %v3957_v58  ;;  %v793_v26 = vsel %vm708_vm8, %v792_v41, %v3736_v2 }
  0xec   :  { %v971_v19 = vsel %vm969_vm6, %v970_v22, %v3954_v37  ;;  %vm1026_vm7 = vcmp.gt.s32.totalorder %v1025_v56, 0  ;;  %v4820_v8 = vxor.u32 2147483648, %v3974_v38  ;;  %v794_v54 = vsel %vm3928_vm14, %v3397_v32, %v791_v50 }
  0xed   :  { %v886_v15 = vadd.s32 127, %v885_v24  ;;  %v972_v44 = vadd.s32 %v971_v19, %v967_v40  ;;  %v4005_v21 = vsel %vm594_vm15, %v597_v59, %v600_v5  ;;  %v882_v55 = vshll.u32 %v3904_v17, %v880_v43 }
  0xee   :  { %v883_v12 = vshrl.u32 %v865_v33, %v881_v18  ;;  %v1027_v27 = vsel %vm1026_vm7, %v1025_v56, 0  ;;  %v4010_v2 = vsel %vm3928_vm14, 0, %v793_v26  ;;  %v4822_v22 = vand.u32 2147483647, %v3408_v57 }
  0xef   :  { %v887_v37 = vshll.u32 %v886_v15, 23  ;;  %v973_v41 = vadd.s32 536870912, %v972_v44  ;;  %v4018_v13 = vsel %vm701_vm3, %v4819_v14, %v3974_v38  ;;  %3020 = vcosq.f32 %v794_v54 }
  0xf0   :  { %v4021_v17 = vand.u32 3, %v4010_v2  ;;  %v1029_v56 = vand.u32 31, %v1027_v27  ;;  %v4028_v4 = vsel %vm698_vm1, %v3957_v58, %v4820_v8  ;;  %3022 = vsinq.f32 %v794_v54 }
  0xf1   :  { %v4031_v50 = vshrl.u32 %v973_v41, 30  ;;  %v884_v33 = vor.u32 %v883_v12, %v882_v55  ;;  %v888_v43 = vor.u32 4788187, %v887_v37  ;;  %v1121_v5 = vand.u32 2139095040, %v3411_v51 }
  0xf2   :  { %v1030_v59 = vsub.s32 32, %v1029_v56  ;;  %v1022_v24 = vand.u32 8388607, %v4822_v22  ;;  %v1028_v26 = vshrl.u32 %v1027_v27, 5  ;;  %v1032_v19 = vshll.u32 %v4869_v29, %v1029_v56 }
  0xf3   :  { %v975_v18 = vshll.u32 %v4031_v50, 30  ;;  %v1035_v54 = vshll.u32 %v4870_v63, %v1029_v56  ;;  %v1041_v55 = vshll.u32 %v4865_v25, %v1029_v56  ;;  %v1038_v37 = vshll.u32 %v4874_v1, %v1029_v56 }
  0xf4   :  { %v1033_v15 = vshrl.u32 %v4870_v63, %v1030_v59  ;;  %v1036_v41 = vshrl.u32 %v4874_v1, %v1030_v59  ;;  %v1039_v14 = vshrl.u32 %v4865_v25, %v1030_v59  ;;  %v1042_v8 = vshrl.u32 %v4866_v20, %v1030_v59 }
  0xf5   :  { %v4042_v12 = vsub.s32 %v972_v44, %v975_v18  ;;  %v889_v45 = vand.u32 2147483647, %v888_v43  ;;  %v891_v27 = vcvt.s32.f32 %v884_v33  ;;  %v1122_v40 = vshrl.u32 %v1121_v5, 23 }
  0xf6   :  { %vm697_vm8 = vcmp.lt.s32.totalorder %v3940_v6, 2  ;;  %v1023_v31 = vor.u32 8388608, %v1022_v24  ;;  %v1031_v58 = vshrl.u32 %v4869_v29, %v1030_v59  ;;  %v1034_v44 = vor.u32 %v1033_v15, %v1032_v19 }
  0xf7   :  { %v978_v52 = vsub.s32 0, %v4042_v12  ;;  %vm811_vm9 = vcmp.lt.s32.totalorder %v3402_v46, 0  ;;  %v1037_v18 = vor.u32 %v1036_v41, %v1035_v54  ;;  %v1043_v38 = vor.u32 %v1042_v8, %v1041_v55 }
  0xf8   :  { %v1044_v16 = vshll.u32 %v4866_v20, %v1029_v56  ;;  %v1045_v43 = vshrl.u32 %v4867_v60, %v1030_v59  ;;  %v968_v33 = vadd.s32 %v3953_v53, %v3962_v28  ;;  %v1040_v22 = vor.u32 %v1039_v14, %v1038_v37 }
  0xf9   :  { %v2862_v5 = vmin.u32 %v978_v52, %v4042_v12  ;;  %vm1047_vm12 = vcmp.lt.s32.totalorder %v1028_v26, 1  ;;  %v4057_v11 = vpop.eup %3020  ;;  %v892_v24 = vmul.f32 %v891_v27, %v889_v45  ;;  %vm1049_vm13 = vcmp.lt.s32.totalorder %v1028_v26, 3 }
  0xfa   :  { %v1046_v9 = vor.u32 %v1045_v43, %v1044_v16  ;;  %v2869_v19 = vadd.s32 4294967169, %v1122_v40  ;;  %v4059_v15 = vpop.eup %3022  ;;  %v4897_v8 = vand.u32 2147483647, %v3402_v46  ;;  %vm1048_vm15 = vcmp.lt.s32.totalorder %v1028_v26, 2 }
  0xfb   :  { %v980_v59 = vclz %v2862_v5  ;;  %vm1050_vm0 = vcmp.lt.s32.totalorder %v1028_v26, 4  ;;  %v1063_v53 = vshll.u32 %v1023_v31, 8  ;;  %v1051_v28 = vsel %vm1047_vm12, %v1031_v58, %v1034_v44 }
  0xfc   :  { %vm4063_vm14 = vcmp.le.f32.partialorder %v4897_v8, 0.7853982  ;;  %v1052_v52 = vsel %vm1050_vm0, %v1040_v22, 2102212464  ;;  %v1055_v45 = vsel %vm1047_vm12, %v1034_v44, %v1037_v18  ;;  %v1056_v16 = vsel %vm1050_vm0, %v1043_v38, 920167782 }
  0xfd   :  { %v2863_v14 = vadd.s32 4294967294, %v980_v59  ;;  %v1053_v40 = vsel %vm1049_vm13, %v1037_v18, %v1052_v52  ;;  %v1057_v54 = vsel %vm1049_vm13, %v1040_v22, %v1056_v16  ;;  %v1059_v41 = vsel %vm1047_vm12, %v1037_v18, %v1040_v22 }
  0xfe   :  { %v893_v55 = vxor.u32 2147483648, %v892_v24  ;;  %v1058_v37 = vsel %vm1048_vm15, %v1055_v45, %v1057_v54  ;;  %v1060_v27 = vsel %vm1050_vm0, %v1046_v9, 1326507024  ;;  %v1128_v43 = vadd.s32 1, %v2869_v19 }
  0xff   :  { %vm2864_vm1 = vcmp.lt.s32.totalorder %v2863_v14, 0  ;;  %v1061_v31 = vsel %vm1049_vm13, %v1043_v38, %v1060_v27  ;;  %v4074_v58 = vmul.u32.u64.low %v1063_v53, %v1058_v37  ;;  %v4075_v5 = vmul.u32.u64.high %v1063_v53, %v1058_v37, %v4074_v58 }
 0x100   :  { %v983_v44 = vsel %vm2864_vm1, 0, %v2863_v14  ;;  %v1054_v8 = vsel %vm1048_vm15, %v1051_v28, %v1053_v40  ;;  %v1062_v59 = vsel %vm1048_vm15, %v1059_v41, %v1061_v31  ;;  %vm1129_vm3 = vcmp.gt.s32.totalorder %v1128_v43, 0 }
 0x101   :  { %v984_v52 = vsub.s32 32, %v983_v44  ;;  %v985_v22 = vshll.u32 %v4042_v12, %v983_v44  ;;  %v988_v18 = vsub.s32 4294967266, %v983_v44  ;;  %v1130_v45 = vsel %vm1129_vm3, %v1128_v43, 0 }
 0x102   :  { %v4085_v9 = vsel %vm697_vm8, %v4028_v4, %v4018_v13  ;;  %vm801_vm2 = vcmp.eq.s32.totalorder %v4021_v17, 0  ;;  %vm804_vm6 = vcmp.eq.s32.totalorder %v4021_v17, 2  ;;  %v1132_v26 = vand.u32 31, %v1130_v45 }
 0x103   :  { %v4089_v38 = vmul.u32.u64.low %v1063_v53, %v1062_v59  ;;  %v4090_v19 = vmul.u32.u64.high %v1063_v53, %v1062_v59, %v4089_v38  ;;  %v894_v28 = vsel %vm811_vm9, %v893_v55, %v892_v24  ;;  %v986_v12 = vshrl.u32 %v968_v33, %v984_v52 }
 0x104   :  { %v989_v16 = vadd.s32 127, %v988_v18  ;;  %v1073_v14 = vadd.s32 1, %v4075_v5  ;;  %v4900_v6 = vsub.s32 4, %v3895_v39  ;;  %v1070_v4 = vmul.u32 %v1063_v53, %v1054_v8 }
 0x105   :  { %v4901_v40 = vand.u32 2147483647, %v3411_v51  ;;  %v1133_v41 = vsub.s32 32, %v1132_v26  ;;  %vm4845_vm7 = vweird.f32 %v3322_v61  ;;  %v4833_v37 = vxor.u32 2147483648, %v4059_v15 }
 0x106   :  { %v896_v13 = vsel %vm811_vm9, %v4900_v6, %v3895_v39  ;;  %v987_v24 = vor.u32 %v986_v12, %v985_v22  ;;  %v990_v55 = vshll.u32 %v989_v16, 23  ;;  %vm4844_vm8 = vweird.f32 %v3383_v3 }
 0x107   :  { %v1125_v54 = vand.u32 8388607, %v4901_v40  ;;  %v897_v27 = vsel %vm4063_vm14, %v3402_v46, %v894_v28  ;;  %vm1072_vm9 = vc.u32 %v4090_v19, %v4074_v58  ;;  %v1135_v39 = vshll.u32 %v4869_v29, %v1132_v26 }
 0x108   :  { %v1138_v53 = vshll.u32 %v4870_v63, %v1132_v26  ;;  %vm800_vm12 = vcmp.lt.s32.totalorder %v4021_v17, 2  ;;  %vm914_vm13 = vcmp.lt.s32.totalorder %v3405_v10, 0  ;;  %v991_v43 = vor.u32 4788187, %v990_v55 }
 0x109   :  { %v994_v31 = vcvt.s32.f32 %v987_v24  ;;  %v1074_v44 = vsel %vm1072_vm9, %v1073_v14, %v4075_v5  ;;  %v1144_v8 = vshll.u32 %v4865_v25, %v1132_v26  ;;  %v4117_v52 = vshrl.u32 %v1130_v45, 5 }
 0x10a   :  { %v1075_v59 = vadd.s32 %v1074_v44, %v1070_v4  ;;  %v1136_v22 = vshrl.u32 %v4870_v63, %v1133_v41  ;;  %v1139_v18 = vshrl.u32 %v4874_v1, %v1133_v41  ;;  %v992_v38 = vand.u32 2147483647, %v991_v43 }
 0x10b   :  { %v1141_v28 = vshll.u32 %v4874_v1, %v1132_v26  ;;  %v1142_v12 = vshrl.u32 %v4865_v25, %v1133_v41  ;;  %v1145_v16 = vshrl.u32 %v4866_v20, %v1133_v41  ;;  %3024 = vcosq.f32 %v897_v27 }
 0x10c   :  { %v1076_v6 = vadd.s32 536870912, %v1075_v59  ;;  %v1126_v40 = vor.u32 8388608, %v1125_v54  ;;  %v1147_v5 = vshll.u32 %v4866_v20, %v1132_v26  ;;  %vm4843_vm15 = vweird.f32 %v3397_v32 }
 0x10d   :  { %v4902_v45 = vand.u32 2147483647, %v3405_v10  ;;  %v995_v4 = vmul.f32 %v994_v31, %v992_v38  ;;  %v1137_v24 = vor.u32 %v1136_v22, %v1135_v39  ;;  %v1140_v55 = vor.u32 %v1139_v18, %v1138_v53 }
 0x10e   :  { %v1146_v43 = vor.u32 %v1145_v16, %v1144_v8  ;;  %3026 = vsinq.f32 %v897_v27  ;;  %v4132_v44 = vshrl.u32 %v1076_v6, 30  ;;  %v1148_v33 = vshrl.u32 %v4867_v60, %v1133_v41 }
 0x10f   :  { %vm4128_vm0 = vcmp.le.f32.partialorder %v4902_v45, 0.7853982  ;;  %vm1150_vm1 = vcmp.lt.s32.totalorder %v4117_v52, 1  ;;  %v803_v26 = vsel %vm801_vm2, %v4057_v11, %v4833_v37  ;;  %v4905_v54 = vxor.u32 2147483648, %v4057_v11 }
 0x110   :  { %v1143_v53 = vor.u32 %v1142_v12, %v1141_v28  ;;  %vm1153_vm3 = vcmp.lt.s32.totalorder %v4117_v52, 4  ;;  %v996_v27 = vxor.u32 2147483648, %v995_v4  ;;  %v1078_v31 = vshll.u32 %v4132_v44, 30 }
 0x111   :  { %v806_v39 = vsel %vm804_vm6, %v4905_v54, %v4059_v15  ;;  %vm1152_vm9 = vcmp.lt.s32.totalorder %v4117_v52, 3  ;;  %v4149_v8 = vshll.u32 %v1126_v40, 8  ;;  %v1149_v22 = vor.u32 %v1148_v33, %v1147_v5 }
 0x112   :  { %vm1151_vm4 = vcmp.lt.s32.totalorder %v4117_v52, 2  ;;  %v1158_v18 = vsel %vm1150_vm1, %v1137_v24, %v1140_v55  ;;  %v1159_v38 = vsel %vm1153_vm3, %v1146_v43, 920167782  ;;  %v4159_v28 = vsel %vm4845_vm7, nan, %v4005_v21 }
 0x113   :  { %4906 = vst [vmem:[#allocation28_spill] sm:$0xff] %v4159_v28  ;;  %v4163_v12 = vsel %vm4063_vm14, 0, %v896_v13  ;;  %v4165_v16 = vsub.s32 %v1075_v59, %v1078_v31  ;;  %v1134_v33 = vshrl.u32 %v4869_v29, %v1133_v41  ;;  %v4171_v6 = vsel %vm4844_vm8, nan, %v4085_v9 }
 0x114   :  { %4907 = vst [vmem:[#allocation29_spill] sm:$0xff] %v4171_v6  ;;  %v4174_v40 = vand.u32 3, %v4163_v12  ;;  %v1155_v21 = vsel %vm1153_vm3, %v1143_v53, 2102212464  ;;  %v1160_v56 = vsel %vm1152_vm9, %v1143_v53, %v1159_v38  ;;  %v807_v13 = vsel %vm800_vm12, %v803_v26, %v806_v39 }
 0x115   :  { %v997_v41 = vsel %vm914_vm13, %v996_v27, %v995_v4  ;;  %v1081_v59 = vsub.s32 0, %v4165_v16  ;;  %v1161_v9 = vsel %vm1151_vm4, %v1158_v18, %v1160_v56  ;;  %v1162_v5 = vsel %vm1150_vm1, %v1140_v55, %v1143_v53  ;;  %v4196_v17 = vpop.eup %3024 }
 0x116   :  { %v1163_v45 = vsel %vm1153_vm3, %v1149_v22, 1326507024  ;;  %v4192_v54 = vmul.u32.u64.low %v4149_v8, %v1161_v9  ;;  %v4193_v31 = vmul.u32.u64.high %v4149_v8, %v1161_v9, %v4192_v54  ;;  %4908 = vst [vmem:[#allocation30_spill] sm:$0xff] %v4196_v17  ;;  %v998_v4 = vsub.s32 4, %v4031_v50 }
 0x117   :  { %vm1017_vm14 = vcmp.lt.s32.totalorder %v3408_v57, 0  ;;  %v2866_v26 = vmin.u32 %v1081_v59, %v4165_v16  ;;  %v1154_v39 = vsel %vm1150_vm1, %v1134_v33, %v1137_v24  ;;  %v1156_v53 = vsel %vm1152_vm9, %v1140_v55, %v1155_v21 }
 0x118   :  { %vm904_vm2 = vcmp.eq.s32.totalorder %v4174_v40, 0  ;;  %vm907_vm6 = vcmp.eq.s32.totalorder %v4174_v40, 2  ;;  %v1164_v27 = vsel %vm1152_vm9, %v1146_v43, %v1163_v45  ;;  %v1224_v22 = vand.u32 2139095040, %v3460_v35  ;;  %v4210_v18 = vpop.eup %3026 }
 0x119   :  { %4909 = vst [vmem:[#allocation31_spill] sm:$0xff] %v4210_v18  ;;  %v4214_v38 = vsel %vm4843_vm15, nan, %v807_v13  ;;  %vm903_vm12 = vcmp.lt.s32.totalorder %v4174_v40, 2  ;;  %v1000_v24 = vsel %vm4128_vm0, %v3405_v10, %v997_v41  ;;  %v1083_v55 = vclz %v2866_v26 }
 0x11a   :  { %4910 = vst [vmem:[#allocation32_spill] sm:$0xff] %v4214_v38  ;;  %v1165_v33 = vsel %vm1151_vm4, %v1162_v5, %v1164_v27  ;;  %v4911_v43 = vand.u32 2147483647, %v3408_v57  ;;  %v1157_v56 = vsel %vm1151_vm4, %v1154_v39, %v1156_v53  ;;  %v1225_v9 = vshrl.u32 %v1224_v22, 23 }
 0x11b   :  { %v4231_v13 = vmul.u32.u64.low %v4149_v8, %v1165_v33  ;;  %v4232_v59 = vmul.u32.u64.high %v4149_v8, %v1165_v33, %v4231_v13  ;;  %v4831_v41 = vxor.u32 2147483648, %v4196_v17  ;;  %v999_v5 = vsel %vm914_vm13, %v998_v4, %v4031_v50 }
 0x11c   :  { %vm4224_vm1 = vcmp.le.f32.partialorder %v4911_v43, 0.7853982  ;;  %v2867_v45 = vadd.s32 4294967294, %v1083_v55  ;;  %v4835_v26 = vand.u32 2147483647, %v3460_v35  ;;  %v4832_v27 = vxor.u32 2147483648, %v4210_v18 }
 0x11d   :  { %v1101_v43 = vsub.s32 4, %v4132_v44  ;;  %v1176_v52 = vadd.s32 1, %v4193_v31  ;;  %v2873_v39 = vadd.s32 4294967169, %v1225_v9  ;;  %3028 = vcosq.f32 %v1000_v24 }
 0x11e   :  { %v1071_v53 = vadd.s32 %v4074_v58, %v4090_v19  ;;  %vm2868_vm4 = vcmp.lt.s32.totalorder %v2867_v45, 0  ;;  %v1173_v22 = vmul.u32 %v4149_v8, %v1157_v56  ;;  %v4247_v50 = vsel %vm4128_vm0, 0, %v999_v5 }
 0x11f   :  { %v1086_v4 = vsel %vm2868_vm4, 0, %v2867_v45  ;;  %vm1175_vm13 = vc.u32 %v4232_v59, %v4192_v54  ;;  %v1231_v55 = vadd.s32 1, %v2873_v39  ;;  %v909_v33 = vsel %vm907_vm6, %v4831_v41, %v4210_v18 }
 0x120   :  { %v1087_v13 = vsub.s32 32, %v1086_v4  ;;  %v1088_v58 = vshll.u32 %v4165_v16, %v1086_v4  ;;  %v1091_v19 = vsub.s32 4294967266, %v1086_v4  ;;  %v906_v14 = vsel %vm904_vm2, %v4196_v17, %v4832_v27 }
 0x121   :  { %v1102_v8 = vsel %vm1017_vm14, %v1101_v43, %v4132_v44  ;;  %v1177_v56 = vsel %vm1175_vm13, %v1176_v52, %v4193_v31  ;;  %vm1232_vm0 = vcmp.gt.s32.totalorder %v1231_v55, 0  ;;  %v1228_v16 = vand.u32 8388607, %v4835_v26 }
 0x122   :  { %v1089_v9 = vshrl.u32 %v1071_v53, %v1087_v13  ;;  %v1092_v5 = vadd.s32 127, %v1091_v19  ;;  %v1178_v45 = vadd.s32 %v1177_v56, %v1173_v22  ;;  %3030 = vsinq.f32 %v1000_v24 }
 0x123   :  { %v1233_v39 = vsel %vm1232_vm0, %v1231_v55, 0  ;;  %v4834_v4 = vand.u32 2147483647, %v3465_v47  ;;  %v1327_v41 = vand.u32 2139095040, %v3465_v47  ;;  %v4272_v44 = vsel %vm4224_vm1, 0, %v1102_v8 }
 0x124   :  { %v1090_v27 = vor.u32 %v1089_v9, %v1088_v58  ;;  %v1093_v37 = vshll.u32 %v1092_v5, 23  ;;  %v1179_v31 = vadd.s32 536870912, %v1178_v45  ;;  %v4276_v43 = vsel %vm903_vm12, %v906_v14, %v909_v33 }
 0x125   :  { %v4279_v52 = vand.u32 3, %v4247_v50  ;;  %v4282_v24 = vand.u32 3, %v4272_v44  ;;  %v1235_v53 = vand.u32 31, %v1233_v39  ;;  %v1229_v58 = vor.u32 8388608, %v1228_v16 }
 0x126   :  { %v1094_v22 = vor.u32 4788187, %v1093_v37  ;;  %v1097_v55 = vcvt.s32.f32 %v1090_v27  ;;  %v4284_v13 = vshrl.u32 %v1179_v31, 30  ;;  %v4286_v19 = vshrl.u32 %v1233_v39, 5 }
 0x127   :  { %v1236_v8 = vsub.s32 32, %v1235_v53  ;;  %v1328_v56 = vshrl.u32 %v1327_v41, 23  ;;  %v4290_v40 = vand.u32 8388607, %v4834_v4  ;;  %v4292_v33 = vpop.eup %3028  ;;  %v1238_v5 = vshll.u32 %v4869_v29, %v1235_v53 }
 0x128   :  { %v1095_v14 = vand.u32 2147483647, %v1094_v22  ;;  %v1181_v9 = vshll.u32 %v4284_v13, 30  ;;  %v1241_v37 = vshll.u32 %v4870_v63, %v1235_v53  ;;  %v1244_v39 = vshll.u32 %v4874_v1, %v1235_v53 }
 0x129   :  { %v1239_v27 = vshrl.u32 %v4870_v63, %v1236_v8  ;;  %v1242_v16 = vshrl.u32 %v4874_v1, %v1236_v8  ;;  %v1247_v41 = vshll.u32 %v4865_v25, %v1235_v53  ;;  %v1245_v26 = vshrl.u32 %v4865_v25, %v1236_v8 }
 0x12a   :  { %v1098_v31 = vmul.f32 %v1097_v55, %v1095_v14  ;;  %v4301_v4 = vsub.s32 %v1178_v45, %v1181_v9  ;;  %v1248_v22 = vshrl.u32 %v4866_v20, %v1236_v8  ;;  %v1174_v6 = vadd.s32 %v4192_v54, %v4232_v59 }
 0x12b   :  { %v4308_v28 = vshll.u32 %v1229_v58, 8  ;;  %v2877_v32 = vadd.s32 4294967169, %v1328_v56  ;;  %v1237_v17 = vshrl.u32 %v4869_v29, %v1236_v8  ;;  %v1240_v55 = vor.u32 %v1239_v27, %v1238_v5 }
 0x12c   :  { %v1099_v3 = vxor.u32 2147483648, %v1098_v31  ;;  %v1184_v61 = vsub.s32 0, %v4301_v4  ;;  %v4312_v45 = vpop.eup %3030  ;;  %v1243_v14 = vor.u32 %v1242_v16, %v1241_v37  ;;  %v1249_v9 = vor.u32 %v1248_v22, %v1247_v41 }
 0x12d   :  { %v1250_v18 = vshll.u32 %v4866_v20, %v1235_v53  ;;  %v1251_v38 = vshrl.u32 %v4867_v60, %v1236_v8  ;;  %vm1010_vm3 = vcmp.eq.s32.totalorder %v4279_v52, 2  ;;  %v1246_v58 = vor.u32 %v1245_v26, %v1244_v39 }
 0x12e   :  { %v1100_v54 = vsel %vm1017_vm14, %v1099_v3, %v1098_v31  ;;  %v2870_v59 = vmin.u32 %v1184_v61, %v4301_v4  ;;  %vm1253_vm9 = vcmp.lt.s32.totalorder %v4286_v19, 1  ;;  %vm1007_vm2 = vcmp.eq.s32.totalorder %v4279_v52, 0 }
 0x12f   :  { %v1103_v56 = vsel %vm4224_vm1, %v3408_v57, %v1100_v54  ;;  %v1252_v5 = vor.u32 %v1251_v38, %v1250_v18  ;;  %vm1255_vm6 = vcmp.lt.s32.totalorder %v4286_v19, 3  ;;  %v1334_v53 = vadd.s32 1, %v2877_v32 }
 0x130   :  { %v1008_v8 = vxor.u32 2147483648, %v4312_v45  ;;  %v1186_v37 = vclz %v2870_v59  ;;  %vm1254_vm14 = vcmp.lt.s32.totalorder %v4286_v19, 2  ;;  %vm1256_vm12 = vcmp.lt.s32.totalorder %v4286_v19, 4 }
 0x131   :  { %3032 = vcosq.f32 %v1103_v56  ;;  %v1258_v61 = vsel %vm1256_vm12, %v1246_v58, 2102212464  ;;  %v1261_v3 = vsel %vm1253_vm9, %v1240_v55, %v1243_v14  ;;  %v1262_v26 = vsel %vm1256_vm12, %v1249_v9, 920167782 }
 0x132   :  { %vm1120_vm4 = vcmp.lt.s32.totalorder %v3411_v51, 0  ;;  %v2871_v21 = vadd.s32 4294967294, %v1186_v37  ;;  %v1257_v18 = vsel %vm1253_vm9, %v1237_v17, %v1240_v55  ;;  %v1263_v32 = vsel %vm1255_vm6, %v1246_v58, %v1262_v26 }
 0x133   :  { %v1265_v38 = vsel %vm1253_vm9, %v1243_v14, %v1246_v58  ;;  %v1259_v27 = vsel %vm1255_vm6, %v1243_v14, %v1258_v61  ;;  %v1264_v16 = vsel %vm1254_vm14, %v1261_v3, %v1263_v32  ;;  %v1266_v39 = vsel %vm1256_vm12, %v1252_v5, 1326507024 }
 0x134   :  { %vm1335_vm1 = vcmp.gt.s32.totalorder %v1334_v53, 0  ;;  %vm2872_vm13 = vcmp.lt.s32.totalorder %v2871_v21, 0  ;;  %v1267_v41 = vsel %vm1255_vm6, %v1249_v9, %v1266_v39  ;;  %3034 = vsinq.f32 %v1103_v56 }
 0x135   :  { %v4345_v17 = vmul.u32.u64.low %v4308_v28, %v1264_v16  ;;  %v4346_v31 = vmul.u32.u64.high %v4308_v28, %v1264_v16, %v4345_v17  ;;  %v1189_v22 = vsel %vm2872_vm13, 0, %v2871_v21  ;;  %v1268_v55 = vsel %vm1254_vm14, %v1265_v38, %v1267_v41 }
 0x136   :  { %v1336_v14 = vsel %vm1335_vm1, %v1334_v53, 0  ;;  %v4914_v54 = vand.u32 2147483647, %v3411_v51  ;;  %v1190_v58 = vsub.s32 32, %v1189_v22  ;;  %v1191_v9 = vshll.u32 %v4301_v4, %v1189_v22 }
 0x137   :  { %v1194_v5 = vsub.s32 4294967266, %v1189_v22  ;;  %v1260_v37 = vsel %vm1254_vm14, %v1257_v18, %v1259_v27  ;;  %v1204_v56 = vsub.s32 4, %v4284_v13  ;;  %v1338_v53 = vand.u32 31, %v1336_v14 }
 0x138   :  { %vm4353_vm0 = vcmp.le.f32.partialorder %v4914_v54, 0.7853982  ;;  %v4362_v61 = vmul.u32.u64.low %v4308_v28, %v1268_v55  ;;  %v4363_v3 = vmul.u32.u64.high %v4308_v28, %v1268_v55, %v4362_v61  ;;  %v1192_v26 = vshrl.u32 %v1174_v6, %v1190_v58 }
 0x139   :  { %v1195_v21 = vadd.s32 127, %v1194_v5  ;;  %v1279_v32 = vadd.s32 1, %v4346_v31  ;;  %v4367_v38 = vadd.s32 3, %v3486_v48  ;;  %v4917_v4 = vxor.u32 2147483648, %v4292_v33 }
 0x13a   :  { %v1276_v18 = vmul.u32 %v4308_v28, %v1260_v37  ;;  %v1339_v27 = vsub.s32 32, %v1338_v53  ;;  %v4378_v16 = vadd.s32 3, %v3510_v30  ;;  %v4385_v48 = vsel %vm1007_vm2, %v4292_v33, %v1008_v8 }
 0x13b   :  { %v4374_v19 = vsel %vm1010_vm3, %v4917_v4, %v4312_v45  ;;  %v1193_v6 = vor.u32 %v1192_v26, %v1191_v9  ;;  %v1196_v39 = vshll.u32 %v1195_v21, 23  ;;  %v1332_v41 = vor.u32 8388608, %v4290_v40  ;;  %v4388_v22 = vpop.eup %3032 }
 0x13c   :  { %v1205_v28 = vsel %vm1120_vm4, %v1204_v56, %v4284_v13  ;;  %vm1278_vm3 = vc.u32 %v4363_v3, %v4345_v17  ;;  %v1341_v30 = vshll.u32 %v4869_v29, %v1338_v53  ;;  %v1344_v55 = vshll.u32 %v4870_v63, %v1338_v53 }
 0x13d   :  { %v1197_v54 = vor.u32 4788187, %v1196_v39  ;;  %v1200_v58 = vcvt.s32.f32 %v1193_v6  ;;  %v1280_v9 = vsel %vm1278_vm3, %v1279_v32, %v4346_v31  ;;  %v1350_v5 = vshll.u32 %v4865_v25, %v1338_v53 }
 0x13e   :  { %v1281_v40 = vadd.s32 %v1280_v9, %v1276_v18  ;;  %v4399_v37 = vshrl.u32 %v1336_v14, 5  ;;  %v1342_v61 = vshrl.u32 %v4870_v63, %v1339_v27  ;;  %v1345_v13 = vshrl.u32 %v4874_v1, %v1339_v27  ;;  %v4407_v6 = vpop.eup %3034 }
 0x13f   :  { %vm1006_vm9 = vcmp.lt.s32.totalorder %v4279_v52, 2  ;;  %v1198_v56 = vand.u32 2147483647, %v1197_v54  ;;  %v1347_v26 = vshll.u32 %v4874_v1, %v1338_v53  ;;  %v1348_v21 = vshrl.u32 %v4865_v25, %v1339_v27 }
 0x140   :  { %v1351_v4 = vshrl.u32 %v4866_v20, %v1339_v27  ;;  %vm1110_vm2 = vcmp.eq.s32.totalorder %v4282_v24, 0  ;;  %vm1113_vm6 = vcmp.eq.s32.totalorder %v4282_v24, 2  ;;  %v4413_v63 = vsel %vm4353_vm0, 0, %v1205_v28 }
 0x141   :  { %v1282_v31 = vadd.s32 536870912, %v1281_v40  ;;  %v1353_v14 = vshll.u32 %v4866_v20, %v1338_v53  ;;  %v4416_v32 = vshll.u32 %v1332_v41, 8  ;;  %v1201_v1 = vmul.f32 %v1200_v58, %v1198_v56 }
 0x142   :  { %v1343_v18 = vor.u32 %v1342_v61, %v1341_v30  ;;  %v1346_v25 = vor.u32 %v1345_v13, %v1344_v55  ;;  %v1352_v39 = vor.u32 %v1351_v4, %v1350_v5  ;;  %vm901_vm14 = vweird.f32 %v3402_v46  ;;  %v4967_v46 = vld [vmem:[#allocation23_spill] sm:$0xff] }
 0x143   :  { %vm4847_vm12 = vweird.f32 %v3405_v10  ;;  %vm1223_vm1 = vcmp.lt.s32.totalorder %v3460_v35, 0  ;;  %v1283_v54 = vshrl.u32 %v1282_v31, 30  ;;  %v1340_v9 = vshrl.u32 %v4869_v29, %v1339_v27 }
 0x144   :  { %v1354_v28 = vshrl.u32 %v4867_v60, %v1339_v27  ;;  %vm1356_vm13 = vcmp.lt.s32.totalorder %v4399_v37, 1  ;;  %v1114_v20 = vxor.u32 2147483648, %v4388_v22  ;;  %v1202_v53 = vxor.u32 2147483648, %v1201_v1 }
 0x145   :  { %v1349_v41 = vor.u32 %v1348_v21, %v1347_v26  ;;  %vm1359_vm3 = vcmp.lt.s32.totalorder %v4399_v37, 4  ;;  %vm1109_vm15 = vcmp.lt.s32.totalorder %v4282_v24, 2  ;;  %v1111_v30 = vxor.u32 2147483648, %v4407_v6 }
 0x146   :  { %v1284_v55 = vshll.u32 %v1283_v54, 30  ;;  %v1355_v58 = vor.u32 %v1354_v28, %v1353_v14  ;;  %vm1358_vm8 = vcmp.lt.s32.totalorder %v4399_v37, 3  ;;  %v1203_v29 = vsel %vm1120_vm4, %v1202_v53, %v1201_v1 }
 0x147   :  { %vm1357_vm7 = vcmp.lt.s32.totalorder %v4399_v37, 2  ;;  %v1364_v60 = vsel %vm1356_vm13, %v1343_v18, %v1346_v25  ;;  %v1365_v27 = vsel %vm1359_vm3, %v1352_v39, 920167782  ;;  %v1206_v5 = vsel %vm4353_vm0, %v3411_v51, %v1203_v29 }
 0x148   :  { %v4439_v61 = vsub.s32 %v1281_v40, %v1284_v55  ;;  %v1360_v13 = vsel %vm1356_vm13, %v1340_v9, %v1343_v18  ;;  %v1361_v56 = vsel %vm1359_vm3, %v1349_v41, 2102212464  ;;  %3036 = vcosq.f32 %v1206_v5 }
 0x149   :  { %v1307_v26 = vsub.s32 4, %v1283_v54  ;;  %v1366_v21 = vsel %vm1358_vm8, %v1349_v41, %v1365_v27  ;;  %v1369_v4 = vsel %vm1359_vm3, %v1355_v58, 1326507024  ;;  %vm4846_vm4 = vweird.f32 %v3408_v57 }
 0x14a   :  { %3038 = vsinq.f32 %v1206_v5  ;;  %v1287_v59 = vsub.s32 0, %v4439_v61  ;;  %v1367_v40 = vsel %vm1357_vm7, %v1364_v60, %v1366_v21  ;;  %v1368_v31 = vsel %vm1356_vm13, %v1346_v25, %v1349_v41 }
 0x14b   :  { %v1362_v14 = vsel %vm1358_vm8, %v1346_v25, %v1361_v56  ;;  %v1370_v1 = vsel %vm1358_vm8, %v1352_v39, %v1369_v4  ;;  %v4460_v18 = vmul.u32.u64.low %v4416_v32, %v1367_v40  ;;  %v4461_v9 = vmul.u32.u64.high %v4416_v32, %v1367_v40, %v4460_v18  ;;  %v4922_v40 = vld [vmem:[#allocation16_spill] sm:$0xff] }
 0x14c   :  { %v1013_v28 = vsel %vm1006_vm9, %v4385_v48, %v4374_v19  ;;  %v4469_v53 = vand.u32 3, %v4413_v63  ;;  %v2874_v41 = vmin.u32 %v1287_v59, %v4439_v61  ;;  %v1521_v25 = vand.u32 3, %v4367_v38 }
 0x14d   :  { %v1112_v39 = vsel %vm1110_vm2, %v4388_v22, %v1111_v30  ;;  %v1115_v52 = vsel %vm1113_vm6, %v1114_v20, %v4407_v6  ;;  %v1308_v19 = vsel %vm1223_vm1, %v1307_v26, %v1283_v54  ;;  %v1371_v48 = vsel %vm1357_vm7, %v1368_v31, %v1370_v1 }
 0x14e   :  { %v1289_v55 = vclz %v2874_v41  ;;  %v1363_v38 = vsel %vm1357_vm7, %v1360_v13, %v1362_v14  ;;  %v4490_v58 = vmul.u32.u64.low %v4416_v32, %v1371_v48  ;;  %v4491_v29 = vmul.u32.u64.high %v4416_v32, %v1371_v48, %v4490_v58 }
 0x14f   :  { %v4496_v60 = vsel %vm901_vm14, nan, %v4276_v43  ;;  %v4500_v27 = vsel %vm4847_vm12, nan, %v1013_v28  ;;  %v4918_v54 = vand.u32 2147483647, %v3460_v35  ;;  %v1382_v37 = vadd.s32 1, %v4461_v9 }
 0x150   :  { %vm1213_vm7 = vcmp.eq.s32.totalorder %v4469_v53, 0  ;;  %vm1216_vm0 = vcmp.eq.s32.totalorder %v4469_v53, 2  ;;  %v2875_v13 = vadd.s32 4294967294, %v1289_v55  ;;  %vm1523_vm9 = vcmp.eq.s32.totalorder %v1521_v25, 0 }
 0x151   :  { %vm4504_vm8 = vcmp.le.f32.partialorder %v4918_v54, 0.7853982  ;;  %vm1526_vm2 = vcmp.eq.s32.totalorder %v1521_v25, 2  ;;  %v1116_v43 = vsel %vm1109_vm15, %v1112_v39, %v1115_v52  ;;  %v1277_v56 = vadd.s32 %v4345_v17, %v4363_v3  ;;  %v4924_v39 = vld [vmem:[#allocation17_spill] sm:$0xff] }
 0x152   :  { %v4517_v26 = vsel %vm4504_vm8, 0, %v1308_v19  ;;  %v1379_v21 = vmul.u32 %v4416_v32, %v1363_v38  ;;  %vm2876_vm6 = vcmp.lt.s32.totalorder %v2875_v13, 0  ;;  %vm1381_vm13 = vc.u32 %v4491_v29, %v4460_v18  ;;  %v4523_v59 = vpop.eup %3036 }
 0x153   :  { %vm1522_vm3 = vcmp.lt.s32.totalorder %v1521_v25, 2  ;;  %v1625_v4 = vand.u32 3, %v4378_v16  ;;  %vm1212_vm15 = vcmp.lt.s32.totalorder %v4469_v53, 2  ;;  %v1292_v24 = vsel %vm2876_vm6, 0, %v2875_v13 }
 0x154   :  { %v1383_v17 = vsel %vm1381_vm13, %v1382_v37, %v4461_v9  ;;  %v4921_v3 = vxor.u32 2147483648, %v3555_v23  ;;  %v4923_v32 = vxor.u32 2147483648, %v4922_v40  ;;  %v4533_v1 = vpop.eup %3038  ;;  %v1293_v28 = vsub.s32 32, %v1292_v24 }
 0x155   :  { %v1294_v16 = vshll.u32 %v4439_v61, %v1292_v24  ;;  %v1297_v41 = vsub.s32 4294967266, %v1292_v24  ;;  %v1728_v52 = vadd.s32 3, %v4924_v39  ;;  %v4539_v19 = vsel %vm4846_vm4, nan, %v1116_v43 }
 0x156   :  { %v1525_v31 = vsel %vm1523_vm9, %v4922_v40, %v4921_v3  ;;  %v1528_v14 = vsel %vm1526_vm2, %v4923_v32, %v3555_v23  ;;  %v4542_v9 = vand.u32 3, %v4517_v26  ;;  %v1384_v48 = vadd.s32 %v1383_v17, %v1379_v21  ;;  %v4957_v32 = vld [vmem:[#allocation13_spill] sm:$0xff] }
 0x157   :  { %v1832_v55 = vadd.s32 3, %v3734_v7  ;;  %v1295_v38 = vshrl.u32 %v1277_v56, %v1293_v28  ;;  %v1298_v23 = vadd.s32 127, %v1297_v41  ;;  %v1529_v58 = vsel %vm1522_vm3, %v1525_v31, %v1528_v14  ;;  %v4929_v14 = vld [vmem:[#allocation19_spill] sm:$0xff] }
 0x158   :  { %vm1627_vm9 = vcmp.eq.s32.totalorder %v1625_v4, 0  ;;  %v1214_v61 = vxor.u32 2147483648, %v4533_v1  ;;  %v1217_v54 = vxor.u32 2147483648, %v4523_v59  ;;  %vm1326_vm2 = vcmp.lt.s32.totalorder %v3465_v47, 0 }
 0x159   :  { %v1385_v37 = vadd.s32 536870912, %v1384_v48  ;;  %vm1630_vm6 = vcmp.eq.s32.totalorder %v1625_v4, 2  ;;  %v1296_v13 = vor.u32 %v1295_v38, %v1294_v16  ;;  %v1299_v43 = vshll.u32 %v1298_v23, 23  ;;  %v4931_v16 = vld [vmem:[#allocation18_spill] sm:$0xff] }
 0x15a   :  { %v1729_v24 = vand.u32 3, %v1728_v52  ;;  %v1936_v21 = vadd.s32 3, %v3837_v34  ;;  %v4552_v56 = vsel %vm180_vm5, nan, %v1529_v58  ;;  %vm1626_vm13 = vcmp.lt.s32.totalorder %v1625_v4, 2 }
 0x15b   :  { %v1386_v17 = vshrl.u32 %v1385_v37, 30  ;;  %v1833_v25 = vand.u32 3, %v1832_v55  ;;  %v1300_v3 = vor.u32 4788187, %v1299_v43  ;;  %v1303_v40 = vcvt.s32.f32 %v1296_v13 }
 0x15c   :  { %v4926_v31 = vand.u32 2147483647, %v3465_v47  ;;  %v4930_v28 = vxor.u32 2147483648, %v4929_v14  ;;  %v4932_v41 = vxor.u32 2147483648, %v4931_v16  ;;  %vm4848_vm5 = vweird.f32 %v3411_v51 }
 0x15d   :  { %v1215_v52 = vsel %vm1213_vm7, %v4523_v59, %v1214_v61  ;;  %v1218_v55 = vsel %vm1216_vm0, %v1217_v54, %v4533_v1  ;;  %v4580_v38 = vadd.s32 %v4460_v18, %v4491_v29  ;;  %v1387_v23 = vshll.u32 %v1386_v17, 30  ;;  %v4933_v29 = vld [vmem:[#allocation21_spill] sm:$0xff] }
 0x15e   :  { %vm4556_vm3 = vcmp.le.f32.partialorder %v4926_v31, 0.7853982  ;;  %v1629_v34 = vsel %vm1627_vm9, %v4931_v16, %v4930_v28  ;;  %v1632_v39 = vsel %vm1630_vm6, %v4932_v41, %v4929_v14  ;;  %v1301_v58 = vand.u32 2147483647, %v1300_v3  ;;  %v4935_v3 = vld [vmem:[#allocation20_spill] sm:$0xff] }
 0x15f   :  { %v1410_v37 = vsub.s32 4, %v1386_v17  ;;  %vm1731_vm9 = vcmp.eq.s32.totalorder %v1729_v24, 0  ;;  %vm1734_vm6 = vcmp.eq.s32.totalorder %v1729_v24, 2  ;;  %v4582_v13 = vsub.s32 %v1384_v48, %v1387_v23 }
 0x160   :  { %v1633_v43 = vsel %vm1626_vm13, %v1629_v34, %v1632_v39  ;;  %vm1835_vm7 = vcmp.eq.s32.totalorder %v1833_v25, 0  ;;  %v1937_v7 = vand.u32 3, %v1936_v21  ;;  %v1219_v31 = vsel %vm1212_vm15, %v1215_v52, %v1218_v55 }
 0x161   :  { %v1304_v14 = vmul.f32 %v1303_v40, %v1301_v58  ;;  %vm1730_vm0 = vcmp.lt.s32.totalorder %v1729_v24, 2  ;;  %vm1838_vm4 = vcmp.eq.s32.totalorder %v1833_v25, 2  ;;  %v1390_v18 = vsub.s32 0, %v4582_v13 }
 0x162   :  { %v4934_v28 = vxor.u32 2147483648, %v4933_v29  ;;  %v4936_v48 = vxor.u32 2147483648, %v4935_v3  ;;  %vm1834_vm12 = vcmp.lt.s32.totalorder %v1833_v25, 2  ;;  %v1411_v21 = vsel %vm1326_vm2, %v1410_v37, %v1386_v17 }
 0x163   :  { %v1305_v4 = vxor.u32 2147483648, %v1304_v14  ;;  %v4937_v53 = vxor.u32 2147483648, %v3762_v0  ;;  %v2040_v40 = vadd.s32 3, %v3924_v36  ;;  %v2878_v34 = vmin.u32 %v1390_v18, %v4582_v13 }
 0x164   :  { %v1733_v16 = vsel %vm1731_vm9, %v4935_v3, %v4934_v28  ;;  %v1736_v41 = vsel %vm1734_vm6, %v4936_v48, %v4933_v29  ;;  %v4938_v39 = vxor.u32 2147483648, %v3738_v62  ;;  %vm1939_vm15 = vcmp.eq.s32.totalorder %v1937_v7, 0  ;;  %v4951_v48 = vld [vmem:[#allocation31_spill] sm:$0xff] }
 0x165   :  { %v1837_v24 = vsel %vm1835_vm7, %v3738_v62, %v4937_v53  ;;  %v2144_v55 = vadd.s32 3, %v4010_v2  ;;  %v1306_v23 = vsel %vm1223_vm1, %v1305_v4, %v1304_v14  ;;  %v1737_v58 = vsel %vm1730_vm0, %v1733_v16, %v1736_v41 }
 0x166   :  { %v1840_v52 = vsel %vm1838_vm4, %v4938_v39, %v3762_v0  ;;  %vm1938_vm13 = vcmp.lt.s32.totalorder %v1937_v7, 2  ;;  %vm1942_vm9 = vcmp.eq.s32.totalorder %v1937_v7, 2  ;;  %v1309_v17 = vsel %vm4504_vm8, %v3460_v35, %v1306_v23 }
 0x167   :  { %v1392_v36 = vclz %v2878_v34  ;;  %v4612_v37 = vsel %vm4556_vm3, 0, %v1411_v21  ;;  %v2041_v62 = vand.u32 3, %v2040_v40  ;;  %3040 = vcosq.f32 %v1309_v17  ;;  %v4943_v21 = vld [vmem:[#allocation12_spill] sm:$0xff]  ;;  %v4945_v34 = vld [vmem:[#allocation27_spill] sm:$0xff] }
 0x168   :  { %v1841_v0 = vsel %vm1834_vm12, %v1837_v24, %v1840_v52  ;;  %v4939_v2 = vxor.u32 2147483648, %v3914_v42  ;;  %v2248_v18 = vadd.s32 3, %v4163_v12  ;;  %3042 = vsinq.f32 %v1309_v17  ;;  %v4947_v52 = vld [vmem:[#allocation25_spill] sm:$0xff] }
 0x169   :  { %v2879_v29 = vadd.s32 4294967294, %v1392_v36  ;;  %v4940_v5 = vxor.u32 2147483648, %v3908_v49  ;;  %v2145_v3 = vand.u32 3, %v2144_v55  ;;  %v4624_v16 = vsel %vm4848_vm5, nan, %v1219_v31 }
 0x16a   :  { %v1941_v14 = vsel %vm1939_vm15, %v3908_v49, %v4939_v2  ;;  %v4627_v25 = vand.u32 3, %v4612_v37  ;;  %v4631_v41 = vsel %vm283_vm10, nan, %v1633_v43  ;;  %v4635_v12 = vsel %vm386_vm11, nan, %v1737_v58 }
 0x16b   :  { %v1944_v28 = vsel %vm1942_vm9, %v4940_v5, %v3914_v42  ;;  %vm2880_vm12 = vcmp.lt.s32.totalorder %v2879_v29, 0  ;;  %vm4944_vm1 = vweird.f32 %v4943_v21  ;;  %vm2043_vm4 = vcmp.eq.s32.totalorder %v2041_v62, 0  ;;  %v4953_v21 = vld [vmem:[#allocation30_spill] sm:$0xff] }
 0x16c   :  { %v4639_v49 = vsel %vm4944_vm1, nan, %v1841_v0  ;;  %vm2046_vm8 = vcmp.eq.s32.totalorder %v2041_v62, 2  ;;  %v1395_v42 = vsel %vm2880_vm12, 0, %v2879_v29  ;;  %v4642_v31 = vsel %vm1938_vm13, %v1941_v14, %v1944_v28 }
 0x16d   :  { %vm2042_vm6 = vcmp.lt.s32.totalorder %v2041_v62, 2  ;;  %v2249_v53 = vand.u32 3, %v2248_v18  ;;  %vm1316_vm10 = vcmp.eq.s32.totalorder %v4542_v9, 0  ;;  %vm1319_vm7 = vcmp.eq.s32.totalorder %v4542_v9, 2 }
 0x16e   :  { %v1396_v43 = vsub.s32 32, %v1395_v42  ;;  %v1397_v24 = vshll.u32 %v4582_v13, %v1395_v42  ;;  %v1400_v40 = vsub.s32 4294967266, %v1395_v42  ;;  %vm2147_vm11 = vcmp.eq.s32.totalorder %v2145_v3, 0  ;;  %v4658_v13 = vld [vmem:[%s4781_s1] sm:$0x1]  ;;  %s3104_s1 = smov [#allocation5]  }
 0x16f   :  { %v4946_v39 = vxor.u32 2147483648, %v4945_v34  ;;  %v4948_v7 = vxor.u32 2147483648, %v4947_v52  ;;  %vm2150_vm0 = vcmp.eq.s32.totalorder %v2145_v3, 2  ;;  %v2352_v58 = vadd.s32 3, %v4247_v50  ;;  %s2816_s23 = sshll.u32 %s3104_s1, 4  ;;  %s2817_s23 = int_to_ptr.vmem [resolvable:$true] %s2816_s23 }
 0x170   :  { %v1398_v17 = vshrl.u32 %v4580_v38, %v1396_v43  ;;  %v1401_v36 = vadd.s32 127, %v1400_v40  ;;  %vm2251_vm15 = vcmp.eq.s32.totalorder %v2249_v53, 0  ;;  %vm2254_vm13 = vcmp.eq.s32.totalorder %v2249_v53, 2  ;;  %s3070_s24 = scalar_lea.vmem %s2817_s23, 1664  ;;  %p3075_p9 = scmp.lt.s32.totalorder %s2817_s23, %s2817_s23 }
 0x171   :  { %v2045_v55 = vsel %vm2043_vm4, %v4947_v52, %v4946_v39  ;;  %v2048_v23 = vsel %vm2046_vm8, %v4948_v7, %v4945_v34  ;;  %vm2146_vm9 = vcmp.lt.s32.totalorder %v2145_v3, 2  ;;  %v4949_v0 = vxor.u32 2147483648, %v4059_v15  ;;  %v3041_v28 = vpop.eup %3040  ;;  %p3071_p8 = scmp.ne.s32.totalorder %s2817_s23, %s3070_s24  ;;  %p3076_p10 = scmp.lt.s32.totalorder %s3070_s24, %s3070_s24 }
 0x172   :  { %v2353_v14 = vand.u32 3, %v2352_v58  ;;  %v2456_v18 = vadd.s32 3, %v4272_v44  ;;  %vm1315_vm12 = vcmp.lt.s32.totalorder %v4542_v9, 2  ;;  %v1399_v50 = vor.u32 %v1398_v17, %v1397_v24  ;;  %v3043_v39 = vpop.eup %3042 }
 0x173   :  { %v2149_v2 = vsel %vm2147_vm11, %v4057_v11, %v4949_v0  ;;  %v1402_v38 = vshll.u32 %v1401_v36, 23  ;;  %v4950_v29 = vxor.u32 2147483648, %v4057_v11  ;;  %vm2250_vm1 = vcmp.lt.s32.totalorder %v2249_v53, 2  ;;  %p3077_p11 = por %p3076_p10, %p3075_p9 }
 0x174   :  { %v4952_v4 = vxor.u32 2147483648, %v4951_v48  ;;  %v4954_v43 = vxor.u32 2147483648, %v4953_v21  ;;  %v2457_v34 = vand.u32 3, %v2456_v18  ;;  %v2560_v44 = vadd.s32 3, %v4413_v63 }
 0x175   :  { %v2152_v5 = vsel %vm2150_vm0, %v4950_v29, %v4059_v15  ;;  %vm87_vm4 = vcmp.ne.f32.partialorder %v4658_v13, 0.0  ;;  %v1403_v24 = vor.u32 4788187, %v1402_v38  ;;  %v1406_v52 = vcvt.s32.f32 %v1399_v50  ;;  %p3078_p12 = pnand %p3077_p11, %p3071_p8 }
 0x176   :  { %v2253_v42 = vsel %vm2251_vm15, %v4953_v21, %v4952_v4  ;;  %v2256_v40 = vsel %vm2254_vm13, %v4954_v43, %v4951_v48  ;;  %vm2355_vm8 = vcmp.eq.s32.totalorder %v2353_v14, 0  ;;  %v2664_v11 = vadd.s32 3, %v4517_v26  ;;  %v4959_v4 = vld [vmem:[#allocation14_spill] sm:$0xff] }
 0x177   :  { %v1317_v15 = vxor.u32 2147483648, %v3043_v39  ;;  %v1320_v7 = vxor.u32 2147483648, %v3041_v28  ;;  %v2049_v58 = vsel %vm2042_vm6, %v2045_v55, %v2048_v23  ;;  %vm2358_vm11 = vcmp.eq.s32.totalorder %v2353_v14, 2 }
 0x178   :  { %vm1313_vm0 = vweird.f32 %v3460_v35  ;;  %v1404_v17 = vand.u32 2147483647, %v1403_v24  ;;  %v2153_v36 = vsel %vm2146_vm9, %v2149_v2, %v2152_v5  ;;  %v2257_v63 = vsel %vm2250_vm1, %v2253_v42, %v2256_v40  ;;  %v4961_v42 = vld [vmem:[#allocation15_spill] sm:$0xff]  ;;  %v4970_v35 = vld [vmem:[#allocation28_spill] sm:$0xff] }
 0x179   :  { %vm2459_vm15 = vcmp.eq.s32.totalorder %v2457_v34, 0  ;;  %vm2354_vm13 = vcmp.lt.s32.totalorder %v2353_v14, 2  ;;  %v2357_v0 = vsel %vm2355_vm8, %v4292_v33, %v1008_v8  ;;  %vm2462_vm5 = vcmp.eq.s32.totalorder %v2457_v34, 2 }
 0x17a   :  { %v2561_v26 = vand.u32 3, %v2560_v44  ;;  %v1407_v18 = vmul.f32 %v1406_v52, %v1404_v17  ;;  %v4955_v62 = vxor.u32 2147483648, %v4292_v33  ;;  %vm2458_vm6 = vcmp.lt.s32.totalorder %v2457_v34, 2  ;;  %v4966_v52 = vld [vmem:[#allocation22_spill] sm:$0xff]  ;;  %v4971_v17 = vld [vmem:[#allocation29_spill] sm:$0xff] }
 0x17b   :  { %v2665_v23 = vand.u32 3, %v2664_v11  ;;  %v1318_v3 = vsel %vm1316_vm10, %v3041_v28, %v1317_v15  ;;  %v1321_v53 = vsel %vm1319_vm7, %v1320_v7, %v3043_v39  ;;  %v2461_v2 = vsel %vm2459_vm15, %v4388_v22, %v1111_v30 }
 0x17c   :  { %v2360_v55 = vsel %vm2358_vm11, %v4955_v62, %v4312_v45  ;;  %vm2563_vm9 = vcmp.eq.s32.totalorder %v2561_v26, 0  ;;  %v1408_v8 = vxor.u32 2147483648, %v1407_v18  ;;  %v2464_v50 = vsel %vm2462_vm5, %v1114_v20, %v4407_v6 }
 0x17d   :  { %vm2562_vm1 = vcmp.lt.s32.totalorder %v2561_v26, 2  ;;  %vm2566_vm8 = vcmp.eq.s32.totalorder %v2561_v26, 2  ;;  %v2565_v33 = vsel %vm2563_vm9, %v4523_v59, %v1214_v61  ;;  %vm2667_vm10 = vcmp.eq.s32.totalorder %v2665_v23, 0  ;;  %v4956_v61 = vld [vmem:[#allocation8_spill] sm:$0xff] }
 0x17e   :  { %v2568_v45 = vsel %vm2566_vm8, %v1217_v54, %v4533_v1  ;;  %vm2670_vm7 = vcmp.eq.s32.totalorder %v2665_v23, 2  ;;  %v1409_v30 = vsel %vm1326_vm2, %v1408_v8, %v1407_v18  ;;  %vm2666_vm11 = vcmp.lt.s32.totalorder %v2665_v23, 2 }
 0x17f   :  { %v2669_v38 = vsel %vm2667_vm10, %v3041_v28, %v1317_v15  ;;  %v2672_v29 = vsel %vm2670_vm7, %v1320_v7, %v3043_v39  ;;  %v1322_v22 = vsel %vm1315_vm12, %v1318_v3, %v1321_v53  ;;  %v1412_v6 = vsel %vm4556_vm3, %v3465_v47, %v1409_v30  ;;  %v4968_v15 = vld [vmem:[#allocation24_spill] sm:$0xff] }
 0x180   :  { %v2361_v20 = vsel %vm2354_vm13, %v2357_v0, %v2360_v55  ;;  %v2465_v59 = vsel %vm2458_vm6, %v2461_v2, %v2464_v50  ;;  %3044 = vcosq.f32 %v1412_v6  ;;  %v2768_v1 = vadd.s32 3, %v4612_v37 }
 0x181   :  { %v2782_v54 = vsub.s32 0, %v4956_v61  ;;  %3046 = vsinq.f32 %v1412_v6  ;;  %v2569_v5 = vsel %vm2562_vm1, %v2565_v33, %v2568_v45  ;;  %v2673_v28 = vsel %vm2666_vm11, %v2669_v38, %v2672_v29 }
 0x182   :  { %v3103_v48 = vmov 0   ;;  %vm4958_vm2 = vweird.f32 %v4957_v32  ;;  %vm4960_vm3 = vweird.f32 %v4959_v4  ;;  %vm4962_vm5 = vweird.f32 %v4961_v42 }
 0x183   :  { %v2779_v9 = vsel %vm87_vm4, 1, %v3103_v48  ;;  %v1946_v14 = vsel %vm4958_vm2, nan, %v4642_v31  ;;  %v2050_v21 = vsel %vm4960_vm3, nan, %v2049_v58  ;;  %v2154_v37 = vsel %vm4962_vm5, nan, %v2153_v36 }
 0x184   :  { %v2783_v43 = vrot.slane %v2779_v9, %v2782_v54  ;;  %v1323_v40 = vsel %vm1313_vm0, nan, %v1322_v22  ;;  %v2258_v34 = vsel %vm901_vm14, nan, %v2257_v63  ;;  %vm4963_vm12 = vweird.f32 %v3405_v10  ;;  %v4972_v63 = vld [vmem:[#allocation32_spill] sm:$0xff] }
 0x185   :  { %v2362_v13 = vsel %vm4963_vm12, nan, %v2361_v20  ;;  %vm4964_vm4 = vweird.f32 %v3408_v57  ;;  %vm4965_vm15 = vweird.f32 %v3411_v51  ;;  %v2674_v39 = vsel %vm1313_vm0, nan, %v2673_v28  ;;  %v4969_v51 = vld [vmem:[#allocation26_spill] sm:$0xff] }
 0x186   :  { %v2466_v44 = vsel %vm4964_vm4, nan, %v2465_v59  ;;  %v2570_v31 = vsel %vm4965_vm15, nan, %v2569_v5  ;;  %v2769_v24 = vand.u32 3, %v2768_v1  ;;  %vm2784_vm13 = vcmp.eq.s32.totalorder %v2783_v43, 1 }
 0x187   :  { %v2785_v11 = vsel %vm2784_vm13, %v4966_v52, %v4552_v56  ;;  %v2786_v10 = vsel %vm2784_vm13, %v4967_v46, %v4631_v41  ;;  %v2787_v57 = vsel %vm2784_vm13, %v4968_v15, %v4635_v12  ;;  %v2788_v7 = vsel %vm2784_vm13, %v4969_v51, %v4639_v49 }
 0x188   :  { %v2789_v58 = vsel %vm2784_vm13, %v4970_v35, %v1946_v14  ;;  %v2790_v36 = vsel %vm2784_vm13, %v4971_v17, %v2050_v21  ;;  %v2791_v56 = vsel %vm2784_vm13, %v4972_v63, %v2154_v37  ;;  %v2792_v41 = vsel %vm2784_vm13, %v4496_v60, %v2258_v34  ;;  %2798 = vst [vmem:[#allocation5] sm:$0xff] %v2785_v11 }
 0x189   :  { %2799 = vst [vmem:[#allocation5 + $0x8] sm:$0xff] %v2786_v10  ;;  %2800 = vst [vmem:[#allocation5 + $0x10] sm:$0xff] %v2787_v57  ;;  %v2793_v12 = vsel %vm2784_vm13, %v4500_v27, %v2362_v13  ;;  %v2794_v49 = vsel %vm2784_vm13, %v4539_v19, %v2466_v44  ;;  %v2795_v0 = vsel %vm2784_vm13, %v4624_v16, %v2570_v31  ;;  %vm1422_vm14 = vcmp.eq.s32.totalorder %v4627_v25, 2 }
 0x18a   :  { %2801 = vst [vmem:[#allocation5 + $0x18] sm:$0xff] %v2788_v7  ;;  %v2796_v26 = vsel %vm2784_vm13, %v1323_v40, %v2674_v39  ;;  %2802 = vst [vmem:[#allocation5 + $0x20] sm:$0xff] %v2789_v58  ;;  %v3045_v60 = vpop.eup %3044  ;;  %vm2774_vm0 = vcmp.eq.s32.totalorder %v2769_v24, 2  ;;  %vm1419_vm6 = vcmp.eq.s32.totalorder %v4627_v25, 0  ;;  %vm2771_vm9 = vcmp.eq.s32.totalorder %v2769_v24, 0 }
 0x18b   :  { %2803 = vst [vmem:[#allocation5 + $0x28] sm:$0xff] %v2790_v36  ;;  %2804 = vst [vmem:[#allocation5 + $0x30] sm:$0xff] %v2791_v56  ;;  %v3047_v27 = vpop.eup %3046  ;;  %v1423_v19 = vxor.u32 2147483648, %v3045_v60  ;;  %vm1418_vm1 = vcmp.lt.s32.totalorder %v4627_v25, 2  ;;  %vm2770_vm8 = vcmp.lt.s32.totalorder %v2769_v24, 2  ;;  %vm1416_vm10 = vweird.f32 %v3465_v47 }
 0x18c   :  { %2805 = vst [vmem:[#allocation5 + $0x38] sm:$0xff] %v2792_v41  ;;  %2806 = vst [vmem:[#allocation5 + $0x40] sm:$0xff] %v2793_v12  ;;  %v1420_v16 = vxor.u32 2147483648, %v3047_v27 }
 0x18d   :  { %2807 = vst [vmem:[#allocation5 + $0x48] sm:$0xff] %v2794_v49  ;;  %2808 = vst [vmem:[#allocation5 + $0x50] sm:$0xff] %v2795_v0  ;;  %v1424_v18 = vsel %vm1422_vm14, %v1423_v19, %v3047_v27  ;;  %v2776_v62 = vsel %vm2774_vm0, %v1423_v19, %v3047_v27 }
 0x18e   :  { %2809 = vst [vmem:[#allocation5 + $0x58] sm:$0xff] %v2796_v26  ;;  %v1421_v55 = vsel %vm1419_vm6, %v3045_v60, %v1420_v16  ;;  %v2773_v23 = vsel %vm2771_vm9, %v3045_v60, %v1420_v16 }
 0x18f   :  { %v1425_v3 = vsel %vm1418_vm1, %v1421_v55, %v1424_v18  ;;  %v2777_v53 = vsel %vm2770_vm8, %v2773_v23, %v2776_v62 }
 0x190   :  { %v1426_v2 = vsel %vm1416_vm10, nan, %v1425_v3  ;;  %v2778_v8 = vsel %vm1416_vm10, nan, %v2777_v53 }
 0x191   :  { %v2797_v50 = vsel %vm2784_vm13, %v1426_v2, %v2778_v8 }
 0x192   :  { %2810 = vst [vmem:[#allocation5 + $0x60] sm:$0xff] %v2797_v50 }
 0x193   :  { %3081 = shalt.err (!%p3078_p12)
}
 0x194   :  { %s3082_s27 = scalar_lea.hbm %s4782_s2, 1664 }
 0x195   :  { %p3083_p13 = scmp.ne.s32.totalorder %s4782_s2, %s3082_s27  ;;  %p3086_p0 = scmp.lt.u32.totalorder %s3082_s27, %s4782_s2 }
 0x197   :  { %p3088_p1 = pnand %p3086_p0, %p3083_p13 }
 0x199   :  { %3091 = shalt.err (!%p3088_p1)
}
 0x19a   :  { %s3105_s4 = smov 128   ;;  %s3106_s5 = smov 8  }
 0x19b   :  { %2822 = dma.vmem_to_hbm [thread:$0]  %s2817_s23, 1664, %s4782_s2, [#allocation4], %s3105_s4, %s3105_s4, %s3106_s5  }
 0x19c   :  { %3094 = dma.done.wait [#allocation4], 1664  }
 0x19d   :  { %3095 = vsyncadd [#allocation4], 4294965632 }
 0x19e   :  { %2826 = vsyncpa [#allocation3], 1 }
 0x19f   :  { %2827 = vsyncpa [#allocation4], 1 }

</bundles_post_ra>
